<compile_context>
chip_gen: v7x
topology: tpu7x:2x2x1
jax: 0.10.0
libtpu: 0.0.40
codegen_flags: <defaults>
</compile_context>

<pallas_src>
import jax
import jax.numpy as jnp
import numpy as np
from jax import lax
from jax.experimental import pallas as pl
from jax.experimental.pallas import tpu as pltpu

NUM_CAPS = 32
CAPS_DIM = 8
IN_CH = 256
KSIZE = 9
STRIDE = 2
OUT_SP = 6                        # (20 - 9) // 2 + 1
N_OUT = NUM_CAPS * CAPS_DIM       # 256
K_DIM = KSIZE * KSIZE * IN_CH     # 20736
TN = 128                          # output lanes per grid block (16 capsules)


def primarycaps_kernel(a_ref, w_ref, b_ref, g_ref, o_ref):
    """grid = (m, j, k); k (reduction axis) is innermost / 'arbitrary'."""
    k = pl.program_id(2)

    @pl.when(k == 0)
    def _():
        o_ref[...] = jnp.zeros_like(o_ref)

    # Hot path: bf16 im2col patches @ bf16 fused capsule weights on the MXU,
    # f32 accumulation directly into the resident output block.
    o_ref[...] += jnp.dot(a_ref[...], w_ref[...],
                          preferred_element_type=jnp.float32)

    @pl.when(k == pl.num_programs(2) - 1)
    def _():
        s = o_ref[...] + b_ref[...]                       # [tm, 128] conv + bias
        # Per-capsule sum of squares, broadcast back to every lane of that
        # capsule with one block-diagonal [128, 128] matmul.
        sumsq = jnp.dot(s * s, g_ref[...], preferred_element_type=jnp.float32)
        # squash: ||s||^2 / (||s|| (1 + ||s||^2)) == sqrt(sumsq) / (1 + sumsq)
        factor = jnp.sqrt(sumsq) * pl.reciprocal(1.0 + sumsq, approx=True)
        o_ref[...] = factor * s


def _choose_tm(m, max_tm=512):
    """Largest M tile <= max_tm that divides M and keeps (8,128) tiling legal."""
    if m <= max_tm:
        return m                      # full-M block (always legal)
    tm = max_tm - (max_tm % 8)
    while tm >= 8:
        if m % tm == 0:
            return tm
        tm -= 8
    return m


def primary_caps_forward(x, w_all, b_all, *, tk=3456):
    """x: [B, 256, 20, 20] f32, w_all: [32, 8, 256, 9, 9], b_all: [32, 8]."""
    B = x.shape[0]
    assert x.shape == (B, IN_CH, 20, 20)

    # ---- glue: im2col in NHWC with (tap, cin) K-order; cast to bf16 early so
    #      the patch gather itself only moves half the bytes. ----
    xh = jnp.transpose(x.astype(jnp.bfloat16), (0, 2, 3, 1))        # [B,20,20,256]
    taps = []
    for kh in range(KSIZE):
        for kw in range(KSIZE):
            taps.append(xh[:, kh:kh + 11:STRIDE, kw:kw + 11:STRIDE, :])  # [B,6,6,256]
    p = jnp.stack(taps, axis=3)                                      # [B,6,6,81,256]
    M = B * OUT_SP * OUT_SP
    a = p.reshape(M, K_DIM)                                          # bf16 [M, 20736]

    # ---- glue: fuse the 32 capsule conv weights into one matmul weight with
    #      matching (kh, kw, cin) K-order; one-time reorder + bf16 cast. ----
    w_mat = jnp.transpose(w_all, (3, 4, 2, 0, 1)).reshape(K_DIM, N_OUT)
    w_mat = w_mat.astype(jnp.bfloat16)
    bias = b_all.reshape(1, N_OUT).astype(jnp.float32)

    # Block-diagonal "same capsule" selector for one 128-lane half
    # (identical for both halves since capsules never straddle a half).
    lane = np.arange(TN)
    g = jnp.asarray((lane[:, None] // CAPS_DIM ==
                     lane[None, :] // CAPS_DIM).astype(np.float32))   # [128, 128]

    assert K_DIM % tk == 0 and tk % 128 == 0
    nk = K_DIM // tk
    tm = _choose_tm(M)
    nm = M // tm
    nj = N_OUT // TN

    out = pl.pallas_call(
        primarycaps_kernel,
        out_shape=jax.ShapeDtypeStruct((M, N_OUT), jnp.float32),
        grid_spec=pltpu.PrefetchScalarGridSpec(
            num_scalar_prefetch=0,
            grid=(nm, nj, nk),
            in_specs=[
                pl.BlockSpec((tm, tk), lambda m, j, k: (m, k)),      # A tile (bf16)
                pl.BlockSpec((tk, TN), lambda m, j, k: (k, j)),      # W tile (bf16)
                pl.BlockSpec((1, TN), lambda m, j, k: (0, j)),       # bias half
                pl.BlockSpec((TN, TN), lambda m, j, k: (0, 0)),      # capsule selector
            ],
            out_specs=pl.BlockSpec((tm, TN), lambda m, j, k: (m, j)),
        ),
        compiler_params=pltpu.CompilerParams(
            dimension_semantics=("parallel", "parallel", "arbitrary")),
    )(a, w_mat, bias, g)

    # ---- glue: rearrange to PyTorch layout [B, 1152, 8];
    #      row within batch = (oh*6 + ow) * 32 + capsule_i. ----
    u = out.reshape(B, OUT_SP * OUT_SP, NUM_CAPS, CAPS_DIM).reshape(B, -1, CAPS_DIM)
    return u


def primary_caps_reference(x, w_all, b_all):
    """Pure-JAX reference matching the PyTorch module exactly."""
    B = x.shape[0]
    W = w_all.reshape(N_OUT, IN_CH, KSIZE, KSIZE)
    out = lax.conv_general_dilated(
        x, W, window_strides=(STRIDE, STRIDE), padding="VALID",
        dimension_numbers=("NCHW", "OIHW", "NCHW"),
        precision=lax.Precision.HIGHEST)
    out = out + b_all.reshape(1, N_OUT, 1, 1)                        # [B, 256, 6, 6]
    u = jnp.transpose(out.reshape(B, NUM_CAPS, CAPS_DIM, OUT_SP, OUT_SP),
                      (0, 3, 4, 1, 2)).reshape(B, -1, CAPS_DIM)      # [B, 1152, 8]
    sq_sum = jnp.sum(u * u, axis=2)
    norm = jnp.sqrt(sq_sum)
    factor = norm ** 2 / (norm * (1.0 + norm ** 2))
    return factor[..., None] * u


if __name__ == "__main__":
    key = jax.random.PRNGKey(0)
    kx, kw, kb = jax.random.split(key, 3)

    B = 2
    x = jax.random.normal(kx, (B, IN_CH, 20, 20), dtype=jnp.float32)

    # Deterministic synthetic Conv2d parameters (uniform(-1/sqrt(fan_in), ...)).
    fan_in = IN_CH * KSIZE * KSIZE
    bound = 1.0 / np.sqrt(fan_in)
    w_all = jax.random.uniform(kw, (NUM_CAPS, CAPS_DIM, IN_CH, KSIZE, KSIZE),
                               dtype=jnp.float32, minval=-bound, maxval=bound)
    b_all = jax.random.uniform(kb, (NUM_CAPS, CAPS_DIM),
                               dtype=jnp.float32, minval=-bound, maxval=bound)

    u = primary_caps_forward(x, w_all, b_all)
    u = jax.block_until_ready(u)
    assert u.shape == (B, 1152, 8)

    u_ref = jax.block_until_ready(primary_caps_reference(x, w_all, b_all))
    np.testing.assert_allclose(np.asarray(u), np.asarray(u_ref),
                               rtol=2e-2, atol=2e-2)

    print("KERNEL_OK")
</pallas_src>

<mosaic_0001>
module attributes {stable_mosaic.version = 11 : i64} {
  func.func @primarycaps_kernel(%arg0: i32, %arg1: i32, %arg2: i32, %arg3: memref<72x3456xbf16, #tpu.memory_space<vmem>>, %arg4: memref<3456x128xbf16, #tpu.memory_space<vmem>>, %arg5: memref<1x128xf32, #tpu.memory_space<vmem>>, %arg6: memref<128x128xf32, #tpu.memory_space<vmem>>, %arg7: memref<72x128xf32, #tpu.memory_space<vmem>>) attributes {dimension_semantics = [#tpu.dimension_semantics<parallel>, #tpu.dimension_semantics<parallel>, #tpu.dimension_semantics<arbitrary>], iteration_bounds = array<i64: 1, 2, 6>, scalar_prefetch = 0 : i64, scratch_operands = 0 : i64, tpu.core_type = #tpu.core_type<tc>, window_params = [{transform_indices = @transform_0, window_bounds = array<i64: 72, 3456>}, {transform_indices = @transform_1, window_bounds = array<i64: 3456, 128>}, {transform_indices = @transform_2, window_bounds = array<i64: 1, 128>}, {pipeline_mode = #tpu.pipeline_mode<synchronous>, transform_indices = @transform_3, window_bounds = array<i64: 128, 128>}, {transform_indices = @transform_4, window_bounds = array<i64: 72, 128>}]} {
    %c0_i32 = arith.constant 0 : i32
    %0 = arith.cmpi eq, %arg2, %c0_i32 : i32
    %1 = arith.extui %0 : i1 to i32
    %c0_i32_0 = arith.constant 0 : i32
    %2 = arith.cmpi ne, %1, %c0_i32_0 : i32
    scf.if %2 {
      %cst_9 = arith.constant 0.000000e+00 : f32
      %12 = vector.broadcast %cst_9 : f32 to vector<72x128xf32>
      %c0_10 = arith.constant 0 : index
      %c0_11 = arith.constant 0 : index
      %13 = vector.load %arg7[%c0_10, %c0_11] : memref<72x128xf32, #tpu.memory_space<vmem>>, vector<72x128xf32>
      tpu.vector_store %arg7[%c0_10, %c0_11], %12 {strides = array<i32>} : memref<72x128xf32, #tpu.memory_space<vmem>>, vector<72x128xf32>,
    } else {
    }
    %c0 = arith.constant 0 : index
    %c0_1 = arith.constant 0 : index
    %3 = vector.load %arg7[%c0, %c0_1] : memref<72x128xf32, #tpu.memory_space<vmem>>, vector<72x128xf32>
    %c0_2 = arith.constant 0 : index
    %c0_3 = arith.constant 0 : index
    %4 = vector.load %arg3[%c0_2, %c0_3] : memref<72x3456xbf16, #tpu.memory_space<vmem>>, vector<72x3456xbf16>
    %c0_4 = arith.constant 0 : index
    %c0_5 = arith.constant 0 : index
    %5 = vector.load %arg4[%c0_4, %c0_5] : memref<3456x128xbf16, #tpu.memory_space<vmem>>, vector<3456x128xbf16>
    %cst = arith.constant dense<0.000000e+00> : vector<72x128xf32>
    %6 = tpu.matmul %4, %5, %cst {dimension_numbers = #tpu.dot_dimension_numbers<[1], [0], [0], [1], [0, 0, 1, 1], [], []>} : vector<72x3456xbf16>, vector<3456x128xbf16>, vector<72x128xf32> -> vector<72x128xf32>
    %7 = arith.addf %3, %6 : vector<72x128xf32>
    %c0_6 = arith.constant 0 : index
    %c0_7 = arith.constant 0 : index
    %8 = vector.load %arg7[%c0_6, %c0_7] : memref<72x128xf32, #tpu.memory_space<vmem>>, vector<72x128xf32>
    tpu.vector_store %arg7[%c0_6, %c0_7], %7 {strides = array<i32>} : memref<72x128xf32, #tpu.memory_space<vmem>>, vector<72x128xf32>,
    %c5_i32 = arith.constant 5 : i32
    %9 = arith.cmpi eq, %arg2, %c5_i32 : i32
    %10 = arith.extui %9 : i1 to i32
    %c0_i32_8 = arith.constant 0 : i32
    %11 = arith.cmpi ne, %10, %c0_i32_8 : i32
    scf.if %11 {
      %c0_9 = arith.constant 0 : index
      %c0_10 = arith.constant 0 : index
      %12 = vector.load %arg7[%c0_9, %c0_10] : memref<72x128xf32, #tpu.memory_space<vmem>>, vector<72x128xf32>
      %c0_11 = arith.constant 0 : index
      %c0_12 = arith.constant 0 : index
      %13 = vector.load %arg5[%c0_11, %c0_12] : memref<1x128xf32, #tpu.memory_space<vmem>>, vector<1x128xf32>
      %14 = vector.broadcast %13 : vector<1x128xf32> to vector<72x128xf32>
      %15 = arith.addf %12, %14 : vector<72x128xf32>
      %16 = arith.mulf %15, %15 : vector<72x128xf32>
      %c0_13 = arith.constant 0 : index
      %c0_14 = arith.constant 0 : index
      %17 = vector.load %arg6[%c0_13, %c0_14] : memref<128x128xf32, #tpu.memory_space<vmem>>, vector<128x128xf32>
      %cst_15 = arith.constant dense<0.000000e+00> : vector<72x128xf32>
      %18 = tpu.matmul %16, %17, %cst_15 {dimension_numbers = #tpu.dot_dimension_numbers<[1], [0], [0], [1], [0, 0, 1, 1], [], []>} : vector<72x128xf32>, vector<128x128xf32>, vector<72x128xf32> -> vector<72x128xf32>
      %19 = math.sqrt %18 : vector<72x128xf32>
      %cst_16 = arith.constant 1.000000e+00 : f32
      %20 = vector.broadcast %cst_16 : f32 to vector<72x128xf32>
      %21 = arith.addf %20, %18 : vector<72x128xf32>
      %22 = tpu.reciprocal %21 {approx = true} : vector<72x128xf32> -> vector<72x128xf32>
      %23 = arith.mulf %19, %22 : vector<72x128xf32>
      %24 = arith.mulf %23, %15 : vector<72x128xf32>
      %c0_17 = arith.constant 0 : index
      %c0_18 = arith.constant 0 : index
      %25 = vector.load %arg7[%c0_17, %c0_18] : memref<72x128xf32, #tpu.memory_space<vmem>>, vector<72x128xf32>
      tpu.vector_store %arg7[%c0_17, %c0_18], %24 {strides = array<i32>} : memref<72x128xf32, #tpu.memory_space<vmem>>, vector<72x128xf32>,
    } else {
    }
    return
  }
  func.func @transform_0(%arg0: i32, %arg1: i32, %arg2: i32) -> (i32, i32) {
    %c0_i32 = arith.constant 0 : i32
    return %arg0, %arg2 : i32, i32
  }
  func.func @transform_1(%arg0: i32, %arg1: i32, %arg2: i32) -> (i32, i32) {
    %c0_i32 = arith.constant 0 : i32
    return %arg2, %arg1 : i32, i32
  }
  func.func @transform_2(%arg0: i32, %arg1: i32, %arg2: i32) -> (i32, i32) {
    %c0_i32 = arith.constant 0 : i32
    %c0_i32_0 = arith.constant 0 : i32
    return %c0_i32, %arg1 : i32, i32
  }
  func.func @transform_3(%arg0: i32, %arg1: i32, %arg2: i32) -> (i32, i32) {
    %c0_i32 = arith.constant 0 : i32
    %c0_i32_0 = arith.constant 0 : i32
    %c0_i32_1 = arith.constant 0 : i32
    return %c0_i32, %c0_i32_0 : i32, i32
  }
  func.func @transform_4(%arg0: i32, %arg1: i32, %arg2: i32) -> (i32, i32) {
    %c0_i32 = arith.constant 0 : i32
    return %arg0, %arg1 : i32, i32
  }
}

</mosaic_0001>

<bundles_post_ra>
// kernel: tpu_custom_call.1
= control target key start
LH: loop header
LB: loop body
LE: loop exit
PB: predicated region body
PF: predicated region fallthrough
CT: control target
= control target key end

     0   :  { %s7544_s0 = inlined_call_operand.hbm [shape: bf16[72,20736], index: 0, kind: input, shape index: {}]   ;;  %s7545_s1 = inlined_call_operand.hbm [shape: bf16[20736,256], index: 1, kind: input, shape index: {}]   ;;  %s7546_s2 = inlined_call_operand.hbm [shape: f32[1,256], index: 2, kind: input, shape index: {}]   ;;  %s7547_s3 = inlined_call_operand.hbm [shape: f32[128,128], index: 3, kind: input, shape index: {}]   ;;  %s7548_s4 = inlined_call_operand.hbm [shape: f32[72,256], index: 4, kind: output, shape index: {}]  }
   0x1   :  { %7562 = sst [smem:[#allocation22_spill]] %s7544_s0 }
   0x2   :  { %7563 = sst [smem:[#allocation23_spill]] %s7545_s1 }
   0x3   :  { %7564 = sst [smem:[#allocation24_spill]] %s7547_s3 }
   0x4   :  { %7565 = sst [smem:[#allocation25_spill]] %s7548_s4 }
   0x5   :  { %9 = vsyncpa [#allocation3], 0 }
   0x6   :  { %11 = vsyncpa [#allocation3 + $0x1], 0 }
   0x7   :  { %12 = vsyncpa [#allocation6], 0 }
   0x8   :  { %14 = vsyncpa [#allocation6 + $0x1], 0 }
   0x9   :  { %15 = vsyncpa [#allocation9], 0 }
   0xa   :  { %16 = vsyncpa [#allocation4], 0 }
   0xb   :  { %18 = vsyncpa [#allocation4 + $0x1], 0  ;;  %s6382_s15 = smov 0   ;;  %s6384_s16 = smov 0  }
   0xc   :  { %s6386_s17 = smov 0   ;;  %s6388_s18 = smov 0  }
   0xd   :  { %s6390_s19 = smov 0   ;;  %s6392_s20 = smov 0  }
   0xe   :  { %s6394_s21 = smov 0   ;;  %s6396_s22 = smov 0  }
   0xf   :  { %s6398_s23 = smov 0   ;;  %s6400_s24 = smov 0  }
  0x10   :  { %s6402_s25 = smov 0   ;;  %s6404_s26 = smov 0  }
  0x11   :  { %s6406_s27 = smov 0   ;;  %s6408_s28 = smov 0  }
  0x12 LB: > { %7566 = sst [smem:[#allocation16_spill]] %s6314_s23  ;;  %s36_s29 = sadd.s32 1, %s6326_s26  ;;  %s6334_s28 = sphi %s6408_s28, %s24_s28   ;;  %s6330_s27 = sphi %s6406_s27, %s7626_s27   ;;  %s6326_s26 = sphi %s6404_s26, %s7625_s26   ;;  %s6322_s25 = sphi %s6402_s25, %s7624_s25   ;;  %s6318_s24 = sphi %s6400_s24, %s7614_s24   ;;  %s6314_s23 = sphi %s6398_s23, %s7613_s23   ;;  %s6310_s22 = sphi %s6396_s22, %s7623_s22   ;;  %s6306_s21 = sphi %s6394_s21, %s7622_s21   ;;  %s6302_s20 = sphi %s6392_s20, %s7621_s20   ;;  %s6298_s19 = sphi %s6390_s19, %s7620_s19   ;;  %s6294_s18 = sphi %s6388_s18, %s7619_s18   ;;  %s6290_s17 = sphi %s6386_s17, %s7618_s17   ;;  %s6286_s16 = sphi %s6384_s16, %s7617_s16   ;;  %s6282_s15 = sphi %s6382_s15, %s7616_s15  }
  0x13   : > { %7567 = sst [smem:[#allocation17_spill]] %s6318_s24  ;;  %p6454_p0 = scmp.ge.s32.totalorder %s36_s29, 6 }
  0x14   : > { %7568 = sst [smem:[#allocation18_spill]] %s6322_s25  ;;  %p7552_p1 = scmp.eq.s32.totalorder %s6334_s28, 0 }
  0x15   : > { %7569 = sst [smem:[#allocation19_spill]] %s6326_s26  ;;  %p87_p2 = scmp.ne.s32.totalorder %s6302_s20, %s6298_s19 }
  0x16   : > { %s7570_s5 = scalar_select %p6454_p0, 1, 0 }
  0x17   : > { %s7628_s29 = smov (%p6454_p0, %s36_s29), 0  ;;  %p89_p3 = por %p87_p2, %p7552_p1 }
  0x18   : > { %7571 = sst [smem:[#allocation20_spill]] %s7628_s29  ;;  %s6472_s7 = ssub.s32 %s6326_s26, %s7628_s29 }
  0x19   : > { %p7551_p6 = scmp.lt.s32.totalorder %s6334_s28, 12  ;;  %s229_s8 = sand.u32 1, %s6334_s28  }
  0x1a   : > { %s231_s9 = sand.u32 1, %s6302_s20   ;;  %s4679_s12 = smul.u32 864, %s6326_s26 }
  0x1b   : > { %s5452_s10 = smul.u32 1728, %s231_s9  ;;  %p6480_p7 = pnand %p7551_p6, %p89_p3 }
  0x1c   : > { %s239_s13 = sadd.s32 %s6330_s27, %s4679_s12  ;;  %s7573_s1 = sld [smem:[#allocation23_spill]] }
  0x1d   : > { %s233_s14 = scalar_lea.vmem [#allocation5], %s5452_s10  ;;  %s4317_s30 = sshll.u32 %s239_s13, 6 }
  0x1e   : > { %s242_s6 = sshll.u32 %s233_s14, 4  ;;  %s6493_s9 = scalar_lea.sflag [#allocation6], %s229_s8  ;;  %s6486_s6 = int_to_ptr.vmem [resolvable:$true] %s242_s6 }
  0x1f   : > { %p6060_p9 = pneg %p6480_p7 }
  0x22   : > { %s6491_s25 = scalar_lea.hbm %s7573_s1, %s4317_s30  ;;  %s6063_s4 = scalar_lea.hbm %s7573_s1, 331776 }
  0x23   : > { %s6058_s24 = scalar_lea.hbm %s6491_s25, 27648  ;;  %p6064_p12 = scmp.lt.u32.totalorder %s6491_s25, %s7573_s1 }
  0x24   : > { %p6059_p8 = scmp.ne.s32.totalorder %s6491_s25, %s6058_s24  ;;  %p6065_p13 = scmp.lt.u32.totalorder %s6063_s4, %s6058_s24 }
  0x25   : > { %p6067_p3 = scmp.lt.u32.totalorder %s6058_s24, %s6491_s25 }
  0x26   : > { %p6061_p10 = pnand %p6060_p9, %p6059_p8  ;;  %p6066_p2 = por %p6065_p13, %p6064_p12 }
  0x28   : > { %p6062_p11 = pneg %p6061_p10  ;;  %p6068_p6 = por %p6067_p3, %p6066_p2 }
  0x2a   : > { %p6069_p1 = pnand %p6068_p6, %p6062_p11 }
  0x2c   : > { %6072 = shalt.err (!%p6069_p1)
}
  0x2d   : > { %s6073_s8 = scalar_lea.vmem %s6486_s6, 27648  ;;  %s6336_s13 = smov [#allocation5]  }
  0x2e   : > { %p6074_p8 = scmp.ne.s32.totalorder %s6486_s6, %s6073_s8  ;;  %s6078_s14 = sshll.u32 %s6336_s13, 4  ;;  %s6079_s14 = int_to_ptr.vmem [resolvable:$false] %s6078_s14 }
  0x2f   : > { %s6080_s10 = scalar_lea.vmem %s6079_s14, 55296  ;;  %p6081_p4 = scmp.lt.s32.totalorder %s6486_s6, %s6079_s14 }
  0x30   : > { %p6076_p10 = pnand %p6074_p8, %p6060_p9  ;;  %p6082_p12 = scmp.lt.s32.totalorder %s6080_s10, %s6073_s8 }
  0x32   : > { %p6077_p5 = pneg %p6076_p10  ;;  %p6083_p13 = por %p6082_p12, %p6081_p4 }
  0x34   : > { %p6084_p2 = pnand %p6083_p13, %p6077_p5 }
  0x36   : > { %6087 = shalt.err (!%p6084_p2)
}
  0x37   : > { %s7553_s24 = smov 128   ;;  %s6338_s12 = smov 64  }
  0x38   : > { %s6339_s4 = smov 4   ;;  %s6523_s29 = sadd.s32 4294967295, %s6334_s28  }
  0x39   : > { %5478 = dma.hbm_to_vmem [thread:$0]  (!%p6480_p7), %s6491_s25, 27648, %s6486_s6, %s6493_s9, %s7553_s24, %s6338_s12, %s6339_s4  }
  0x3a   : > { %p4312_p1 = scmp.ge.s32.totalorder %s6334_s28, 1  ;;  %p7554_p4 = scmp.eq.s32.totalorder %s6523_s29, 0 }
  0x3b   : > { %p179_p5 = scmp.lt.s32.totalorder %s6334_s28, 13  ;;  %p7574_p6 = scmp.ne.s32.totalorder %s6298_s19, %s6294_s18 }
  0x3c   : > { %s6340_s25 = smov [#allocation8]   ;;  %s7578_s3 = sld [smem:[#allocation24_spill]] }
  0x3d   : > { %p6533_p9 = por %p7574_p6, %p7554_p4  ;;  %p6537_p11 = pnand %p4312_p1, %p179_p5 }
  0x3e   : > { %s191_s6 = sshll.u32 %s6340_s25, 4  ;;  %s192_s6 = int_to_ptr.vmem [resolvable:$true] %s191_s6 }
  0x3f   : > { %s7575_s30 = scalar_select %p6533_p9, 1, 0 }
  0x40   : > { %s7576_s8 = scalar_select %p6537_p11, 1, 0 }
  0x41   : > { %p5468_p7 = pneg %p6537_p11 }
  0x42   : > { %s6088_s14 = scalar_lea.hbm %s7578_s3, 2048 }
  0x43   : > { %p6545_p3 = pnand %p5468_p7, %p7554_p4  ;;  %p6089_p8 = scmp.ne.s32.totalorder %s7578_s3, %s6088_s14 }
  0x44   : > { %p6095_p2 = scmp.lt.u32.totalorder %s6088_s14, %s7578_s3 }
  0x45   : > { %p6090_p10 = pneg %p6545_p3 }
  0x47   : > { %p6091_p12 = pnand %p6090_p10, %p6089_p8 }
  0x49   : > { %p6092_p13 = pneg %p6091_p12 }
  0x4b   : > { %p6097_p1 = pnand %p6095_p2, %p6092_p13 }
  0x4d   : > { %6100 = shalt.err (!%p6097_p1)
}
  0x4e   : > { %s6101_s24 = scalar_lea.vmem %s192_s6, 2048  ;;  %p6109_p4 = scmp.lt.s32.totalorder %s192_s6, %s192_s6 }
  0x4f   : > { %p6102_p5 = scmp.ne.s32.totalorder %s192_s6, %s6101_s24  ;;  %p6110_p9 = scmp.lt.s32.totalorder %s6101_s24, %s6101_s24 }
  0x51   : > { %p6104_p6 = pnand %p6102_p5, %p6090_p10  ;;  %p6111_p11 = por %p6110_p9, %p6109_p4 }
  0x53   : > { %p6105_p7 = pneg %p6104_p6 }
  0x55   : > { %p6112_p0 = pnand %p6111_p11, %p6105_p7 }
  0x57   : > { %6115 = shalt.err (!%p6112_p0)
}
  0x58   : > { %s6341_s18 = smov 8   ;;  %s7579_s13 = smov 128  }
  0x59   : > { %5471 = dma.hbm_to_vmem [thread:$0]  (!%p6545_p3), %s7578_s3, 2048, %s192_s6, [#allocation9], %s7579_s13, %s7579_s13, %s6341_s18  }
  0x5a   : > { %s52_s24 = sadd.s32 1, %s6314_s23  ;;  %p59_p0 = scmp.ne.s32.totalorder %s6314_s23, %s6310_s22 }
  0x5b   : > { %p7580_p4 = scmp.eq.s32.totalorder %s6472_s7, 0  ;;  %p7582_p9 = scmp.eq.s32.totalorder %s6334_s28, 0 }
  0x5c   : > { %p65_p8 = scmp.ne.s32.totalorder %s6310_s22, %s6306_s21  ;;  %s205_s14 = sand.u32 1, %s6314_s23  }
  0x5d   : > { %s6573_s11 = scalar_select %p7580_p4, %s6314_s23, %s52_s24  }
  0x5e   : > { %p61_p11 = por %p7582_p9, %p59_p0  ;;  %s4678_s4 = smul.u32 1728, %s6326_s26 }
  0x5f   : > { %7581 = sst [smem:[#allocation21_spill]] %s6573_s11  ;;  %p7583_p10 = scmp.eq.s32.totalorder %s6523_s29, 0 }
  0x60   : > { %s5451_s10 = smul.u32 972, %s205_s14  ;;  %s7585_s0 = sld [smem:[#allocation22_spill]] }
  0x61   : > { %p6583_p12 = por %p7583_p10, %p65_p8  ;;  %p7586_p3 = scmp.lt.s32.totalorder %s6334_s28, 12 }
  0x62   : > { %s209_s18 = scalar_lea.vmem [#allocation2], %s5451_s10  ;;  %s6600_s24 = scalar_lea.sflag [#allocation3], %s205_s14 }
  0x63   : > { %p6594_p13 = pnand %p7586_p3, %p61_p11  ;;  %s219_s13 = sshll.u32 %s209_s18, 4  ;;  %s6598_s13 = int_to_ptr.vmem [resolvable:$true] %s219_s13 }
  0x65   : > { %p6118_p1 = pneg %p6594_p13 }
  0x66   : > { %s6590_s6 = scalar_lea.hbm %s7585_s0, %s4678_s4  ;;  %s6121_s3 = scalar_lea.hbm %s7585_s0, 93312 }
  0x67   : > { %s6116_s1 = scalar_lea.hbm %s6590_s6, 15552  ;;  %p6122_p7 = scmp.lt.u32.totalorder %s6590_s6, %s7585_s0 }
  0x68   : > { %p6117_p2 = scmp.ne.s32.totalorder %s6590_s6, %s6116_s1  ;;  %p6123_p0 = scmp.lt.u32.totalorder %s6121_s3, %s6116_s1 }
  0x69   : > { %p6125_p9 = scmp.lt.u32.totalorder %s6116_s1, %s6590_s6 }
  0x6a   : > { %p6119_p5 = pnand %p6118_p1, %p6117_p2  ;;  %p6124_p4 = por %p6123_p0, %p6122_p7 }
  0x6c   : > { %p6120_p6 = pneg %p6119_p5  ;;  %p6126_p11 = por %p6125_p9, %p6124_p4 }
  0x6e   : > { %p6127_p8 = pnand %p6126_p11, %p6120_p6 }
  0x70   : > { %6130 = shalt.err (!%p6127_p8)
}
  0x71   : > { %s6131_s14 = scalar_lea.vmem %s6598_s13, 15552  ;;  %s6342_s10 = smov [#allocation2]  }
  0x72   : > { %p6132_p10 = scmp.ne.s32.totalorder %s6598_s13, %s6131_s14  ;;  %s6136_s18 = sshll.u32 %s6342_s10, 4  ;;  %s6137_s18 = int_to_ptr.vmem [resolvable:$false] %s6136_s18 }
  0x73   : > { %s6138_s26 = scalar_lea.vmem %s6137_s18, 31104  ;;  %p6139_p5 = scmp.lt.s32.totalorder %s6598_s13, %s6137_s18 }
  0x74   : > { %p6134_p3 = pnand %p6132_p10, %p6118_p1  ;;  %p6140_p7 = scmp.lt.s32.totalorder %s6138_s26, %s6131_s14 }
  0x76   : > { %p6135_p2 = pneg %p6134_p3  ;;  %p6141_p0 = por %p6140_p7, %p6139_p5 }
  0x78   : > { %p6142_p4 = pnand %p6141_p0, %p6135_p2 }
  0x7a   : > { %6145 = shalt.err (!%p6142_p4)
}
  0x7b   : > { %s6343_s3 = smov 10368   ;;  %s6344_s11 = smov 1728  }
  0x7c   : > { %s6345_s1 = smov 108   ;;  %s4311_s4 = sadd.s32 4294967294, %s6334_s28  }
  0x7d   : > { %5475 = dma.hbm_to_vmem [thread:$0]  (!%p6594_p13), %s6590_s6, 15552, %s6598_s13, %s6600_s24, %s6343_s3, %s6344_s11, %s6345_s1  }
  0x7e   : > { %s106_s12 = sadd.s32 1, %s6290_s17  ;;  %s7588_s14 = sadd.s32 1, %s6330_s27 }
  0x7f   : > { %p7589_p1 = scmp.ne.s32.totalorder %s7570_s5, 0  ;;  %p113_p6 = scmp.ne.s32.totalorder %s6290_s17, %s6286_s16 }
  0x80   : > { %p119_p9 = scmp.ne.s32.totalorder %s6286_s16, %s6282_s15  ;;  %p166_p8 = scmp.eq.s32.totalorder %s6523_s29, 11 }
  0x81   : > { %s7630_s14 = smov (!%p7589_p1, %s7588_s14), %s6330_s27  ;;  %p7590_p10 = scmp.eq.s32.totalorder %s6334_s28, 0 }
  0x82   : > { %p41_p11 = scmp.ge.s32.totalorder %s7630_s14, 2  ;;  %p7592_p13 = scmp.eq.s32.totalorder %s6523_s29, 0 }
  0x83   : > { %p6642_p3 = por %p113_p6, %p7590_p10  ;;  %p6657_p5 = por %p166_p8, %p113_p6 }
  0x84   : > { %p6651_p2 = por %p119_p9, %p7592_p13  ;;  %s7632_s14 = smov (%p41_p11, %s7630_s14), 0 }
  0x85   : > { %s7594_s6 = scalar_select %p6657_p5, 1, 0 }
  0x86   : > { %s7593_s5 = scalar_select %p6651_p2, 1, 0 }
  0x87   : > { %p172_p7 = scmp.eq.s32.totalorder %s4311_s4, 11  ;;  %s76_s13 = ssub.s32 %s6330_s27, %s7632_s14 }
  0x88   : > { %s254_s24 = sand.u32 1, %s6290_s17   ;;  %s77_s10 = sor.u32 %s76_s13, %s6472_s7 }
  0x89   : > { %p104_p0 = scmp.eq.s32.totalorder %s76_s13, 0  ;;  %p78_p4 = scmp.eq.s32.totalorder %s77_s10, 0 }
  0x8a   : > { %p6668_p1 = por %p172_p7, %p119_p9  ;;  %s7596_s3 = sadd.s32 1, %s6302_s20 }
  0x8b   : > { %s6673_s26 = scalar_select %p104_p0, %s6290_s17, %s106_s12  }
  0x8c   : > { %s7595_s18 = scalar_select %p6668_p1, 1, 0 }
  0x8d   : > { %s6678_s11 = scalar_select %p78_p4, %s6302_s20, %s7596_s3  }
  0x8e   : > { %s4318_s1 = sshll.u32 %s6330_s27, 4  ;;  %s255_s7 = scalar_lea.vmem [#allocation7], %s254_s24 }
  0x8f   : > { %s6684_s4 = scalar_lea.hbm %s7546_s2, %s4318_s1  ;;  %s262_s13 = sshll.u32 %s255_s7, 4  ;;  %s6686_s13 = int_to_ptr.vmem [resolvable:$true] %s262_s13 }
  0x90   : > { %p7597_p6 = scmp.lt.s32.totalorder %s6334_s28, 12  ;;  %s6146_s10 = scalar_lea.hbm %s6684_s4, 16 }
  0x91   : > { %p6147_p11 = scmp.ne.s32.totalorder %s6684_s4, %s6146_s10  ;;  %s6151_s24 = scalar_lea.hbm %s7546_s2, 32 }
  0x92   : > { %p6692_p9 = pnand %p7597_p6, %p6642_p3  ;;  %p6152_p3 = scmp.lt.u32.totalorder %s6684_s4, %s7546_s2 }
  0x93   : > { %p6153_p7 = scmp.lt.u32.totalorder %s6151_s24, %s6146_s10  ;;  %p6155_p4 = scmp.lt.u32.totalorder %s6146_s10, %s6684_s4 }
  0x94   : > { %p6148_p8 = pneg %p6692_p9 }
  0x95   : > { %p6154_p0 = por %p6153_p7, %p6152_p3 }
  0x96   : > { %p6149_p10 = pnand %p6148_p8, %p6147_p11 }
  0x97   : > { %p6156_p6 = por %p6155_p4, %p6154_p0 }
  0x98   : > { %p6150_p13 = pneg %p6149_p10 }
  0x9a   : > { %p6157_p1 = pnand %p6156_p6, %p6150_p13 }
  0x9c   : > { %6160 = shalt.err (!%p6157_p1)
}
  0x9d   : > { %s6161_s1 = scalar_lea.vmem %s6686_s13, 16  ;;  %s6346_s7 = smov [#allocation7]  }
  0x9e   : > { %p6162_p11 = scmp.ne.s32.totalorder %s6686_s13, %s6161_s1  ;;  %s6166_s0 = sshll.u32 %s6346_s7, 4  ;;  %s6167_s0 = int_to_ptr.vmem [resolvable:$false] %s6166_s0 }
  0x9f   : > { %s6168_s23 = scalar_lea.vmem %s6167_s0, 32  ;;  %p6169_p2 = scmp.lt.s32.totalorder %s6686_s13, %s6167_s0 }
  0xa0   : > { %p6164_p10 = pnand %p6162_p11, %p6148_p8  ;;  %p6170_p3 = scmp.lt.s32.totalorder %s6168_s23, %s6161_s1 }
  0xa2   : > { %p6165_p5 = pneg %p6164_p10  ;;  %p6171_p7 = por %p6170_p3, %p6169_p2 }
  0xa4   : > { %p6172_p0 = pnand %p6171_p7, %p6165_p5 }
  0xa6   : > { %6175 = shalt.err (!%p6172_p0)
}
  0xa7   : > { %5481 = dma.hbm_to_vmem [thread:$0]  (!%p6692_p9), %s6684_s4, 16, %s6686_s13, %s6493_s9  }
  0xa8   : > { %p7599_p1 = scmp.ne.s32.totalorder %s7576_s8, 0 }
  0xa9   : > { %s273_s10 = sand.u32 (!%p7599_p1), 1, %s6310_s22  }
  0xaa   : > { %271 = sbr.rel (%p7599_p1) target bundleno = 1015 (0x3f7), region = 36  ;;  %s274_s21 = scalar_lea.sflag (!%p7599_p1), [#allocation3], %s273_s10 }
  0xab   : > { %s5453_s24 = smul.u32 (!%p7599_p1), 972, %s273_s10 }
  0xad   : > { %s6725_s3 = scalar_lea.vmem (!%p7599_p1), [#allocation2], %s5453_s24 }
  0xb1   : > { %6261 = dma.done.wait (%p6583_p12), %s274_s21, 15552  }
  0xb2   : > { %6263 = vsyncadd (%p6583_p12), %s274_s21, 4294951744  ;;  %s282_s12 = sand.u32 1, %s6523_s29   ;;  %s284_s9 = sand.u32 1, %s6298_s19  }
  0xb3   : > { %s5454_s4 = smul.u32 1728, %s284_s9  ;;  %s283_s8 = scalar_lea.sflag [#allocation6], %s282_s12 }
  0xb4   : > { %p7600_p2 = scmp.ne.s32.totalorder %s7575_s30, 0 }
  0xb5   : > { %s6733_s13 = scalar_lea.vmem [#allocation5], %s5454_s4 }
  0xb6   : > { %6265 = dma.done.wait (%p7600_p2), %s283_s8, 27648  }
  0xb7   : > { %6267 = vsyncadd (%p7600_p2), %s283_s8, 4294939648  ;;  %s6740_s1 = sand.u32 1, %s6286_s16   ;;  %p7601_p12 = scmp.ne.s32.totalorder %s7593_s5, 0 }
  0xb8   : > { %s294_s25 = scalar_lea.vmem [#allocation7], %s6740_s1 }
  0xb9   : > { %6269 = dma.done.wait (%p7601_p12), %s283_s8, 16  }
  0xba   : > { %6271 = vsyncadd (%p7601_p12), %s283_s8, 4294967280  ;;  %p7602_p5 = scmp.eq.s32.totalorder %s6523_s29, 0 }
  0xbc   : > { %6273 = dma.done.wait (%p7602_p5), [#allocation9], 2048   ;;  %p7603_p9 = pmov %p7602_p5 }
  0xbd   : > { %s5455_s30 = smul.u32 72, %s6740_s1  ;;  %s7604_s0 = sld [smem:[#allocation17_spill]] }
  0xbe   : > { %6275 = vsyncadd (%p7603_p9), [#allocation9], 4294965248 }
  0xbf   : > { %s6752_s7 = scalar_lea.vmem [#allocation10], %s5455_s30 }
  0xc3   : > { %p4321_p8 = scmp.ne.s32.totalorder %s7604_s0, 0 }
  0xc4   : > { %v6347_v0 = vmov (!%p4321_p8), 0.0  }
  0xc5   : > { %340 = sbr.rel (%p4321_p8) target bundleno = 204 (0xcc), region = 56  ;;  %341 = vst [vmem:[%s6752_s7] sm:$0xff] (!%p4321_p8), %v6347_v0  ;;  %342 = vst [vmem:[%s6752_s7 + $0x8] sm:$0xff] (!%p4321_p8), %v6347_v0 }
  0xc6   : > { %343 = vst [vmem:[%s6752_s7 + $0x10] sm:$0xff] (!%p4321_p8), %v6347_v0  ;;  %344 = vst [vmem:[%s6752_s7 + $0x18] sm:$0xff] (!%p4321_p8), %v6347_v0 }
  0xc7   : > { %345 = vst [vmem:[%s6752_s7 + $0x20] sm:$0xff] (!%p4321_p8), %v6347_v0  ;;  %346 = vst [vmem:[%s6752_s7 + $0x28] sm:$0xff] (!%p4321_p8), %v6347_v0 }
  0xc8   : > { %347 = vst [vmem:[%s6752_s7 + $0x30] sm:$0xff] (!%p4321_p8), %v6347_v0  ;;  %348 = vst [vmem:[%s6752_s7 + $0x38] sm:$0xff] (!%p4321_p8), %v6347_v0 }
  0xc9   : > { %349 = vst [vmem:[%s6752_s7 + $0x40] sm:$0xff] (!%p4321_p8), %v6347_v0 }
  0xcc PF: > { %v5619_v1 = vld [vmem:[%s6733_s13 + $0x40] sm:$0xff]   ;;  %v5623_v5 = vld [vmem:[%s6733_s13 + $0x48] sm:$0xff]   ;;  %v5627_v9 = vld [vmem:[%s6733_s13 + $0x50] sm:$0xff]   ;;  %vm6349_vm0 = vmmov 0   ;;  %s7605_s29 = sld [smem:[#allocation17_spill]] }
  0xcd   : > { %v5620_v2 = vld [vmem:[%s6733_s13 + $0xc0] sm:$0xff]   ;;  %4680 = vmatprep.subr.bf16.mxu0 %v5619_v1  ;;  %v5624_v6 = vld [vmem:[%s6733_s13 + $0xc8] sm:$0xff]   ;;  %v5628_v10 = vld [vmem:[%s6733_s13 + $0xd0] sm:$0xff]  }
  0xce   : > { %v5621_v3 = vld [vmem:[%s6733_s13] sm:$0xff]   ;;  %4726 = vmatprep.subr.bf16.mxu1 %v5620_v2  ;;  %v5625_v7 = vld [vmem:[%s6733_s13 + $0x8] sm:$0xff]   ;;  %v5629_v11 = vld [vmem:[%s6733_s13 + $0x10] sm:$0xff]  }
  0xcf   : > { %v5622_v4 = vld [vmem:[%s6733_s13 + $0x80] sm:$0xff]   ;;  %4681 = vmatpush3.bf16.msra.mxu0 %v5621_v3  ;;  %v5626_v8 = vld [vmem:[%s6733_s13 + $0x88] sm:$0xff]   ;;  %v5630_v12 = vld [vmem:[%s6733_s13 + $0x90] sm:$0xff]  }
  0xd0   : > { %4727 = vmatpush3.bf16.msra.mxu1 %v5622_v4  ;;  %4682 = vmatprep.subr.bf16.mxu0 %v5623_v5  ;;  %v5631_v13 = vld [vmem:[%s6733_s13 + $0x58] sm:$0xff]   ;;  %v5635_v17 = vld [vmem:[%s6733_s13 + $0x60] sm:$0xff]   ;;  %v5639_v21 = vld [vmem:[%s6733_s13 + $0x68] sm:$0xff]  }
  0xd1   : > { %4728 = vmatprep.subr.bf16.mxu1 %v5624_v6  ;;  %v5632_v14 = vld [vmem:[%s6733_s13 + $0xd8] sm:$0xff]   ;;  %v5636_v18 = vld [vmem:[%s6733_s13 + $0xe0] sm:$0xff]   ;;  %v5640_v22 = vld [vmem:[%s6733_s13 + $0xe8] sm:$0xff]  }
  0xd2   : > { %v5633_v15 = vld [vmem:[%s6733_s13 + $0x18] sm:$0xff]   ;;  %v5637_v19 = vld [vmem:[%s6733_s13 + $0x20] sm:$0xff]   ;;  %v5641_v23 = vld [vmem:[%s6733_s13 + $0x28] sm:$0xff]   ;;  %p4673_p13 = scmp.ne.s32.totalorder %s7605_s29, 5 }
  0xd3   : > { %4683 = vmatpush3.bf16.msra.mxu0 %v5625_v7  ;;  %v5634_v16 = vld [vmem:[%s6733_s13 + $0x98] sm:$0xff]   ;;  %v5638_v20 = vld [vmem:[%s6733_s13 + $0xa0] sm:$0xff]   ;;  %v5642_v24 = vld [vmem:[%s6733_s13 + $0xa8] sm:$0xff]   ;;  %vm6351_vm1 = vmmov (!%p4673_p13), 0  }
  0xd4   : > { %4729 = vmatpush3.bf16.msra.mxu1 %v5626_v8  ;;  %4684 = vmatprep.subr.bf16.mxu0 %v5627_v9  ;;  %v5643_v25 = vld [vmem:[%s6733_s13 + $0x70] sm:$0xff]   ;;  %v5647_v29 = vld [vmem:[%s6733_s13 + $0x78] sm:$0xff]   ;;  %v5657_v37 = vld [vmem:[%s6733_s13 + $0x140] sm:$0xff]  }
  0xd5   : > { %4730 = vmatprep.subr.bf16.mxu1 %v5628_v10  ;;  %v5644_v26 = vld [vmem:[%s6733_s13 + $0xf0] sm:$0xff]   ;;  %v5648_v30 = vld [vmem:[%s6733_s13 + $0xf8] sm:$0xff]   ;;  %v5658_v38 = vld [vmem:[%s6733_s13 + $0x100] sm:$0xff]  }
  0xd6   : > { %v5645_v27 = vld [vmem:[%s6733_s13 + $0x30] sm:$0xff]   ;;  %v5649_v31 = vld [vmem:[%s6733_s13 + $0x38] sm:$0xff]   ;;  %v5659_v39 = vld [vmem:[%s6733_s13 + $0x148] sm:$0xff]  }
  0xd7   : > { %4685 = vmatpush3.bf16.msra.mxu0 %v5629_v11  ;;  %v5646_v28 = vld [vmem:[%s6733_s13 + $0xb0] sm:$0xff]   ;;  %v5650_v32 = vld [vmem:[%s6733_s13 + $0xb8] sm:$0xff]   ;;  %v5660_v40 = vld [vmem:[%s6733_s13 + $0x1c0] sm:$0xff]  }
  0xd8   : > { %4731 = vmatpush3.bf16.msra.mxu1 %v5630_v12  ;;  %4686 = vmatprep.subr.bf16.mxu0 %v5631_v13  ;;  %v5651_v33 = vld [vmem:[%s6725_s3] ss:$108 sps:$4 sm:$0xff]   ;;  %v5653_v34 = vld [vmem:[%s6725_s3 + $0x4] ss:$108 sps:$4 sm:$0xff]   ;;  %v5654_v35 = vld [vmem:[%s6725_s3 + $0x8] ss:$108 sps:$4 sm:$0xff]  }
  0xd9   : > { %4732 = vmatprep.subr.bf16.mxu1 %v5632_v14  ;;  %v5656_v36 = vld [vmem:[%s6725_s3 + $0xc] ss:$108 sps:$4 sm:$0xff]   ;;  %2884 = vmatprep.mubr.bf16.mxu0 %v5653_v34  ;;  %v5663_v43 = vld [vmem:[%s6725_s3 + $0xdc] ss:$108 sps:$4 sm:$0xff]   ;;  %v5665_v44 = vld [vmem:[%s6725_s3 + $0xe4] ss:$108 sps:$4 sm:$0xff]  }
  0xda   : > { %2956 = vmatprep.mubr.bf16.mxu1 %v5656_v36  ;;  %v5661_v41 = vld [vmem:[%s6733_s13 + $0x108] sm:$0xff]   ;;  %v5662_v42 = vld [vmem:[%s6733_s13 + $0x180] sm:$0xff]   ;;  %v5669_v47 = vld [vmem:[%s6733_s13 + $0x150] sm:$0xff]  }
  0xdb   : > { %4687 = vmatpush3.bf16.msra.mxu0 %v5633_v15  ;;  %v5667_v45 = vld [vmem:[%s6725_s3 + $0xd8] ss:$108 sps:$4 sm:$0xff]   ;;  %v5668_v46 = vld [vmem:[%s6725_s3 + $0xe0] ss:$108 sps:$4 sm:$0xff]   ;;  %v5675_v52 = vld [vmem:[%s6725_s3 + $0x1bc] ss:$108 sps:$4 sm:$0xff]  }
  0xdc   : > { %4733 = vmatpush3.bf16.msra.mxu1 %v5634_v16  ;;  %4688 = vmatprep.subr.bf16.mxu0 %v5635_v17  ;;  %v5670_v48 = vld [vmem:[%s6733_s13 + $0x1c8] sm:$0xff]   ;;  %v5671_v49 = vld [vmem:[%s6733_s13 + $0x110] sm:$0xff]   ;;  %v5677_v53 = vld [vmem:[%s6733_s13 + $0x158] sm:$0xff]  }
  0xdd   : > { %4734 = vmatprep.subr.bf16.mxu1 %v5636_v18  ;;  %v5672_v50 = vld [vmem:[%s6733_s13 + $0x188] sm:$0xff]   ;;  %v5678_v54 = vld [vmem:[%s6733_s13 + $0x1d0] sm:$0xff]   ;;  %v5681_v57 = vld [vmem:[%s6733_s13 + $0x118] sm:$0xff]  }
  0xde   : > { %v5673_v51 = vld [vmem:[%s6725_s3 + $0x1b4] ss:$108 sps:$4 sm:$0xff]   ;;  %v5679_v55 = vld [vmem:[%s6725_s3 + $0x1b0] ss:$108 sps:$4 sm:$0xff]   ;;  %v5680_v56 = vld [vmem:[%s6725_s3 + $0x1b8] ss:$108 sps:$4 sm:$0xff]  }
  0xdf   : > { %4689 = vmatpush3.bf16.msra.mxu0 %v5637_v19  ;;  %v5682_v58 = vld [vmem:[%s6733_s13 + $0x190] sm:$0xff]   ;;  %v5683_v59 = vld [vmem:[%s6733_s13 + $0x160] sm:$0xff]   ;;  %v5684_v60 = vld [vmem:[%s6733_s13 + $0x1d8] sm:$0xff]  }
  0xe0   : > { %4735 = vmatpush3.bf16.msra.mxu1 %v5638_v20  ;;  %4690 = vmatprep.subr.bf16.mxu0 %v5639_v21  ;;  %v5685_v61 = vld [vmem:[%s6733_s13 + $0x120] sm:$0xff]   ;;  %v5686_v62 = vld [vmem:[%s6733_s13 + $0x198] sm:$0xff]   ;;  %v5693_v3 = vld [vmem:[%s6733_s13 + $0x168] sm:$0xff]  }
  0xe1   : > { %4736 = vmatprep.subr.bf16.mxu1 %v5640_v22  ;;  %v5687_v63 = vld [vmem:[%s6725_s3 + $0x28c] ss:$108 sps:$4 sm:$0xff]   ;;  %v5689_v0 = vld [vmem:[%s6725_s3 + $0x294] ss:$108 sps:$4 sm:$0xff]   ;;  %v5692_v2 = vld [vmem:[%s6725_s3 + $0x290] ss:$108 sps:$4 sm:$0xff]  }
  0xe2   : > { %v5691_v1 = vld [vmem:[%s6725_s3 + $0x288] ss:$108 sps:$4 sm:$0xff]   ;;  %v5694_v4 = vld [vmem:[%s6733_s13 + $0x1e0] sm:$0xff]   ;;  %v471_v9 = vld [vmem:[%s6725_s3 + $0x360] sm:$0xff] }
  0xe3   : > { %4691 = vmatpush3.bf16.msra.mxu0 %v5641_v23  ;;  %v5695_v5 = vld [vmem:[%s6733_s13 + $0x128] sm:$0xff]   ;;  %v5696_v6 = vld [vmem:[%s6733_s13 + $0x1a0] sm:$0xff]   ;;  %v5697_v7 = vld [vmem:[%s6733_s13 + $0x170] sm:$0xff]   ;;  %v4431_v10 = vcombine.high %v471_v9, %v471_v9  ;;  %v4430_v12 = vcombine.low %v471_v9, %v471_v9 }
  0xe4   : > { %4737 = vmatpush3.bf16.msra.mxu1 %v5642_v24  ;;  %4692 = vmatprep.subr.bf16.mxu0 %v5643_v25  ;;  %v5698_v8 = vld [vmem:[%s6733_s13 + $0x1e8] sm:$0xff]   ;;  %v472_v11 = vld [vmem:[%s6725_s3 + $0x368] sm:$0xff]  ;;  %v5710_v22 = vld [vmem:[%s6725_s3 + $0x10] ss:$108 sps:$4 sm:$0xff]  }
  0xe5   : > { %4738 = vmatprep.subr.bf16.mxu1 %v5644_v26  ;;  %v4433_v13 = vcombine.high %v472_v11, %v472_v11  ;;  %v5701_v14 = vld [vmem:[%s6733_s13 + $0x130] sm:$0xff]   ;;  %v4432_v15 = vcombine.low %v472_v11, %v472_v11  ;;  %v5702_v16 = vld [vmem:[%s6733_s13 + $0x1a8] sm:$0xff]   ;;  %v5706_v18 = vld [vmem:[%s6733_s13 + $0x178] sm:$0xff]  }
  0xe6   : > { %v5705_v17 = vld [vmem:[%s6733_s13 + $0x1f0] sm:$0xff]   ;;  %v5708_v20 = vld [vmem:[%s6733_s13 + $0x138] sm:$0xff]   ;;  %v5714_v25 = vld [vmem:[%s6733_s13 + $0x240] sm:$0xff]  }
  0xe7   : > { %4693 = vmatpush3.bf16.msra.mxu0 %v5645_v27  ;;  %v5707_v19 = vld [vmem:[%s6733_s13 + $0x1b0] sm:$0xff]   ;;  %v5709_v21 = vld [vmem:[%s6733_s13 + $0x1f8] sm:$0xff]  }
  0xe8   : > { %4739 = vmatpush3.bf16.msra.mxu1 %v5646_v28  ;;  %4694 = vmatprep.subr.bf16.mxu0 %v5647_v29  ;;  %v5712_v23 = vld [vmem:[%s6725_s3 + $0x14] ss:$108 sps:$4 sm:$0xff]   ;;  %v5715_v26 = vld [vmem:[%s6725_s3 + $0x18] ss:$108 sps:$4 sm:$0xff]   ;;  %v5717_v27 = vld [vmem:[%s6725_s3 + $0x1c] ss:$108 sps:$4 sm:$0xff]  }
  0xe9   : > { %4740 = vmatprep.subr.bf16.mxu1 %v5648_v30  ;;  %v5713_v24 = vld [vmem:[%s6733_s13 + $0x1b8] sm:$0xff]   ;;  %v5718_v28 = vld [vmem:[%s6733_s13 + $0x200] sm:$0xff]   ;;  %v5719_v29 = vld [vmem:[%s6733_s13 + $0x248] sm:$0xff]  }
  0xea   : > { %v5720_v30 = vld [vmem:[%s6733_s13 + $0x2c0] sm:$0xff]   ;;  %v5725_v34 = vld [vmem:[%s6725_s3 + $0xe8] ss:$108 sps:$4 sm:$0xff]  }
  0xeb   : > { %4695 = vmatpush3.bf16.msra.mxu0 %v5649_v31  ;;  %v5721_v31 = vld [vmem:[%s6733_s13 + $0x208] sm:$0xff]   ;;  %v5728_v36 = vld [vmem:[%s6725_s3 + $0xf0] ss:$108 sps:$4 sm:$0xff]  }
  0xec   : > { %4741 = vmatpush3.bf16.msra.mxu1 %v5650_v32  ;;  %4772 = vmatprep.subr.bf16.mxu0 %v5657_v37  ;;  %v5722_v32 = vld [vmem:[%s6733_s13 + $0x280] sm:$0xff]   ;;  %v5729_v37 = vld [vmem:[%s6733_s13 + $0x250] sm:$0xff]   ;;  %v5769_v11 = vld [vmem:[%s6733_s13 + $0x2f8] sm:$0xff]  }
  0xed   : > { %4818 = vmatprep.subr.bf16.mxu1 %v5660_v40  ;;  %v5732_v40 = vld [vmem:[%s6733_s13 + $0x288] sm:$0xff]   ;;  %v5767_v9 = vld [vmem:[%s6733_s13 + $0x2b0] sm:$0xff]  }
  0xee   : > { %2885 = vmatmul.mubr.bf16.vlgmr.msra.gmra.mrb[0].mxu0 %v5651_v33  ;;  %v5723_v33 = vld [vmem:[%s6725_s3 + $0xec] ss:$108 sps:$4 sm:$0xff]  }
  0xef   : > { %2957 = vmatmul.mubr.bf16.vlgmr.msra.gmra.mrb[0].mxu1 %v5654_v35  ;;  %4773 = vmatpush3.bf16.msra.mxu0 %v5658_v38  ;;  %v5726_v35 = vld [vmem:[%s6725_s3 + $0xf4] ss:$108 sps:$4 sm:$0xff]  }
  0xf0   : > { %4774 = vmatprep.subr.bf16.mxu0 %v5659_v39  ;;  %4819 = vmatpush3.bf16.msra.mxu1 %v5662_v42  ;;  %v5730_v38 = vld [vmem:[%s6733_s13 + $0x2c8] sm:$0xff]   ;;  %v5731_v39 = vld [vmem:[%s6733_s13 + $0x210] sm:$0xff]   ;;  %v5735_v42 = vld [vmem:[%s6733_s13 + $0x258] sm:$0xff]  }
  0xf1   : > { %2892 = vmatprep.mubr.bf16.mxu0 %v5663_v43  ;;  %2964 = vmatprep.mubr.bf16.mxu1 %v5665_v44  ;;  %v5736_v43 = vld [vmem:[%s6733_s13 + $0x2d0] sm:$0xff]  }
  0xf2   : > { %4820 = vmatprep.subr.bf16.mxu1 %v5670_v48  ;;  %v5737_v44 = vld [vmem:[%s6725_s3 + $0x1c0] ss:$108 sps:$4 sm:$0xff]   ;;  %v5742_v48 = vld [vmem:[%s6725_s3 + $0x1c8] ss:$108 sps:$4 sm:$0xff]  }
  0xf3   : > { %4775 = vmatpush3.bf16.msra.mxu0 %v5661_v41  ;;  %v5733_v41 = vld [vmem:[%s6725_s3 + $0x1c4] ss:$108 sps:$4 sm:$0xff]  }
  0xf4   : > { %4776 = vmatprep.subr.bf16.mxu0 %v5669_v47  ;;  %4821 = vmatpush3.bf16.msra.mxu1 %v5672_v50  ;;  %v5740_v47 = vld [vmem:[%s6725_s3 + $0x1cc] ss:$108 sps:$4 sm:$0xff]   ;;  %v5744_v50 = vld [vmem:[%s6733_s13 + $0x2d8] sm:$0xff]  }
  0xf5   : > { %4822 = vmatprep.subr.bf16.mxu1 %v5678_v54  ;;  %v5749_v54 = vld [vmem:[%s6725_s3 + $0x298] ss:$108 sps:$4 sm:$0xff]  }
  0xf6   : > { %2893 = vmatmul.mubr.bf16.gmra.mrb[4].mxu0 %v5667_v45  ;;  %v5738_v45 = vld [vmem:[%s6733_s13 + $0x218] sm:$0xff]  }
  0xf7   : > { %2965 = vmatmul.mubr.bf16.gmra.mrb[4].mxu1 %v5668_v46  ;;  %4777 = vmatpush3.bf16.msra.mxu0 %v5671_v49  ;;  %v5739_v46 = vld [vmem:[%s6733_s13 + $0x290] sm:$0xff]   ;;  %v5743_v49 = vld [vmem:[%s6733_s13 + $0x260] sm:$0xff]  }
  0xf8   : > { %2900 = vmatprep.mubr.bf16.mxu0 %v5673_v51  ;;  %2972 = vmatprep.mubr.bf16.mxu1 %v5675_v52  ;;  %v5745_v51 = vld [vmem:[%s6733_s13 + $0x220] sm:$0xff]   ;;  %v5746_v52 = vld [vmem:[%s6733_s13 + $0x298] sm:$0xff]  }
  0xf9   : > { %4778 = vmatprep.subr.bf16.mxu0 %v5677_v53  ;;  %4823 = vmatpush3.bf16.msra.mxu1 %v5682_v58  ;;  %v5747_v53 = vld [vmem:[%s6725_s3 + $0x29c] ss:$108 sps:$4 sm:$0xff]   ;;  %v5754_v58 = vld [vmem:[%s6725_s3 + $0x2a0] ss:$108 sps:$4 sm:$0xff]  }
  0xfa   : > { %4824 = vmatprep.subr.bf16.mxu1 %v5684_v60  ;;  %v5756_v60 = vld [vmem:[%s6733_s13 + $0x2a0] sm:$0xff]  }
  0xfb   : > { %4779 = vmatpush3.bf16.msra.mxu0 %v5681_v57  ;;  %v5753_v57 = vld [vmem:[%s6733_s13 + $0x2e0] sm:$0xff]  }
  0xfc   : > { %4780 = vmatprep.subr.bf16.mxu0 %v5683_v59  ;;  %v5755_v59 = vld [vmem:[%s6733_s13 + $0x228] sm:$0xff]  }
  0xfd   : > { %4825 = vmatpush3.bf16.msra.mxu1 %v5686_v62  ;;  %v5758_v62 = vld [vmem:[%s6733_s13 + $0x2e8] sm:$0xff]  }
  0xfe   : > { %2901 = vmatmul.mubr.bf16.gmra.mrb[8].mxu0 %v5679_v55  ;;  %4826 = vmatprep.subr.bf16.mxu1 %v5694_v4  ;;  %v5750_v55 = vld [vmem:[%s6725_s3 + $0x2a4] ss:$108 sps:$4 sm:$0xff]   ;;  %v474_v4 = vld [vmem:[%s6725_s3 + $0x378] sm:$0xff] }
  0xff   : > { %2973 = vmatmul.mubr.bf16.gmra.mrb[8].mxu1 %v5680_v56  ;;  %4781 = vmatpush3.bf16.msra.mxu0 %v5685_v61  ;;  %v5752_v56 = vld [vmem:[%s6733_s13 + $0x268] sm:$0xff]   ;;  %v5757_v61 = vld [vmem:[%s6733_s13 + $0x270] sm:$0xff]  }
 0x100   : > { %2908 = vmatprep.mubr.bf16.mxu0 %v5687_v63  ;;  %2980 = vmatprep.mubr.bf16.mxu1 %v5689_v0  ;;  %v473_v63 = vld [vmem:[%s6725_s3 + $0x370] sm:$0xff] }
 0x101   : > { %4782 = vmatprep.subr.bf16.mxu0 %v5693_v3  ;;  %4827 = vmatpush3.bf16.msra.mxu1 %v5696_v6  ;;  %v4435_v0 = vcombine.high %v473_v63, %v473_v63  ;;  %v5761_v3 = vld [vmem:[%s6733_s13 + $0x2a8] sm:$0xff]   ;;  %v4436_v6 = vcombine.low %v474_v4, %v474_v4 }
 0x102   : > { %4828 = vmatprep.subr.bf16.mxu1 %v5698_v8  ;;  %v5766_v8 = vld [vmem:[%s6733_s13 + $0x278] sm:$0xff]  }
 0x103   : > { %4783 = vmatpush3.bf16.msra.mxu0 %v5695_v5  ;;  %v4437_v5 = vcombine.high %v474_v4, %v474_v4  ;;  %v5833_v4 = vld [vmem:[%s6733_s13 + $0x3b8] sm:$0xff]  }
 0x104   : > { %4784 = vmatprep.subr.bf16.mxu0 %v5697_v7  ;;  %v5765_v7 = vld [vmem:[%s6733_s13 + $0x2f0] sm:$0xff]  }
 0x105   : > { %4829 = vmatpush3.bf16.msra.mxu1 %v5702_v16  ;;  %v5775_v16 = vld [vmem:[%s6725_s3 + $0x28] ss:$108 sps:$4 sm:$0xff]  }
 0x106   : > { %2909 = vmatmul.mubr.bf16.gmra.mrb[12].mxu0 %v5691_v1  ;;  %4830 = vmatprep.subr.bf16.mxu1 %v5705_v17  ;;  %v5760_v1 = vld [vmem:[%s6733_s13 + $0x230] sm:$0xff]  }
 0x107   : > { %2981 = vmatmul.mubr.bf16.gmra.mrb[12].mxu1 %v5692_v2  ;;  %2916 = vmatprep.mubr.bf16.mxu0 %v4431_v10  ;;  %v4434_v2 = vcombine.low %v473_v63, %v473_v63  ;;  %v5768_v10 = vld [vmem:[%s6733_s13 + $0x238] sm:$0xff]   ;;  %v5777_v17 = vld [vmem:[%s6725_s3 + $0x2c] ss:$108 sps:$4 sm:$0xff]  }
 0x108   : > { %2988 = vmatprep.mubr.bf16.mxu1 %v4433_v13  ;;  %4785 = vmatpush3.bf16.msra.mxu0 %v5701_v14  ;;  %v5772_v13 = vld [vmem:[%s6725_s3 + $0x24] ss:$108 sps:$4 sm:$0xff]   ;;  %v5827_v63 = vld [vmem:[%s6733_s13 + $0x3b0] sm:$0xff]  }
 0x109   : > { %4786 = vmatprep.subr.bf16.mxu0 %v5706_v18  ;;  %4831 = vmatpush3.bf16.msra.mxu1 %v5707_v19  ;;  %v5773_v14 = vld [vmem:[%s6733_s13 + $0x2b8] sm:$0xff]   ;;  %v5778_v18 = vld [vmem:[%s6733_s13 + $0x300] sm:$0xff]   ;;  %v5779_v19 = vld [vmem:[%s6733_s13 + $0x348] sm:$0xff]  }
 0x10a   : > { %4832 = vmatprep.subr.bf16.mxu1 %v5709_v21  ;;  %v5781_v21 = vld [vmem:[%s6733_s13 + $0x308] sm:$0xff]  }
 0x10c   : > { %4787 = vmatpush3.bf16.msra.mxu0 %v5708_v20  ;;  %v5780_v20 = vld [vmem:[%s6733_s13 + $0x3c0] sm:$0xff]  }
 0x10d   : > { %4833 = vmatpush3.bf16.msra.mxu1 %v5713_v24  ;;  %4864 = vmatprep.subr.bf16.mxu0 %v5714_v25  ;;  %v5785_v24 = vld [vmem:[%s6725_s3 + $0xf8] ss:$108 sps:$4 sm:$0xff]  }
 0x10e   : > { %2917 = vmatmul.mubr.bf16.gmra.mrb[16].mxu0 %v4430_v12  ;;  %4910 = vmatprep.subr.bf16.mxu1 %v5720_v30  ;;  %v5770_v12 = vld [vmem:[%s6725_s3 + $0x20] ss:$108 sps:$4 sm:$0xff]   ;;  %v5786_v25 = vld [vmem:[%s6725_s3 + $0x104] ss:$108 sps:$4 sm:$0xff]  }
 0x10f   : > { %2989 = vmatmul.mubr.bf16.gmra.mrb[16].mxu1 %v4432_v15  ;;  %3028 = vmatprep.mubr.bf16.mxu0 %v5712_v23  ;;  %v5774_v15 = vld [vmem:[%s6733_s13 + $0x340] sm:$0xff]   ;;  %v5792_v30 = vld [vmem:[%s6733_s13 + $0x388] sm:$0xff]  }
 0x110   : > { %3100 = vmatprep.mubr.bf16.mxu1 %v5717_v27  ;;  %v5783_v23 = vld [vmem:[%s6725_s3 + $0xfc] ss:$108 sps:$4 sm:$0xff]  }
 0x111   : > { %v5789_v27 = vld [vmem:[%s6733_s13 + $0x350] sm:$0xff]  }
 0x116   : > { %3029 = vmatmul.mubr.bf16.vlgmr.msra.gmra.mrb[20].mxu0 %v5710_v22  ;;  %v5782_v22 = vld [vmem:[%s6733_s13 + $0x380] sm:$0xff]  }
 0x117   : > { %4865 = vmatpush3.bf16.msra.mxu0 %v5718_v28  ;;  %3101 = vmatmul.mubr.bf16.vlgmr.msra.gmra.mrb[20].mxu1 %v5715_v26  ;;  %v5788_v26 = vld [vmem:[%s6725_s3 + $0x100] ss:$108 sps:$4 sm:$0xff]  }
 0x118   : > { %4866 = vmatprep.subr.bf16.mxu0 %v5719_v29  ;;  %4911 = vmatpush3.bf16.msra.mxu1 %v5722_v32  ;;  %v5790_v28 = vld [vmem:[%s6733_s13 + $0x3c8] sm:$0xff]   ;;  %v5791_v29 = vld [vmem:[%s6733_s13 + $0x310] sm:$0xff]   ;;  %v5795_v32 = vld [vmem:[%s6733_s13 + $0x358] sm:$0xff]  }
 0x119   : > { %3036 = vmatprep.mubr.bf16.mxu0 %v5723_v33  ;;  %3108 = vmatprep.mubr.bf16.mxu1 %v5726_v35  ;;  %v5796_v33 = vld [vmem:[%s6733_s13 + $0x3d0] sm:$0xff]   ;;  %v5798_v35 = vld [vmem:[%s6733_s13 + $0x318] sm:$0xff]  }
 0x11a   : > { %4912 = vmatprep.subr.bf16.mxu1 %v5730_v38  ;;  %v5802_v38 = vld [vmem:[%s6725_s3 + $0x1d8] ss:$108 sps:$4 sm:$0xff]  }
 0x11b   : > { %4867 = vmatpush3.bf16.msra.mxu0 %v5721_v31  ;;  %v5793_v31 = vld [vmem:[%s6725_s3 + $0x1d4] ss:$108 sps:$4 sm:$0xff]  }
 0x11c   : > { %4868 = vmatprep.subr.bf16.mxu0 %v5729_v37  ;;  %4913 = vmatpush3.bf16.msra.mxu1 %v5732_v40  ;;  %v5800_v37 = vld [vmem:[%s6725_s3 + $0x1dc] ss:$108 sps:$4 sm:$0xff]  }
 0x11d   : > { %4914 = vmatprep.subr.bf16.mxu1 %v5736_v43  ;;  %v5804_v40 = vld [vmem:[%s6733_s13 + $0x3d8] sm:$0xff]   ;;  %v5807_v43 = vld [vmem:[%s6725_s3 + $0x2ac] ss:$108 sps:$4 sm:$0xff]  }
 0x11e   : > { %3037 = vmatmul.mubr.bf16.gmra.mrb[24].mxu0 %v5725_v34  ;;  %v5797_v34 = vld [vmem:[%s6725_s3 + $0x1d0] ss:$108 sps:$4 sm:$0xff]  }
 0x11f   : > { %3109 = vmatmul.mubr.bf16.gmra.mrb[24].mxu1 %v5728_v36  ;;  %4869 = vmatpush3.bf16.msra.mxu0 %v5731_v39  ;;  %v5799_v36 = vld [vmem:[%s6733_s13 + $0x390] sm:$0xff]   ;;  %v5803_v39 = vld [vmem:[%s6733_s13 + $0x360] sm:$0xff]  }
 0x120   : > { %3044 = vmatprep.mubr.bf16.mxu0 %v5733_v41  ;;  %4870 = vmatprep.subr.bf16.mxu0 %v5735_v42  ;;  %v5805_v41 = vld [vmem:[%s6733_s13 + $0x320] sm:$0xff]   ;;  %v5806_v42 = vld [vmem:[%s6733_s13 + $0x398] sm:$0xff]  }
 0x121   : > { %4915 = vmatpush3.bf16.msra.mxu1 %v5739_v46  ;;  %3116 = vmatprep.mubr.bf16.mxu1 %v5740_v47  ;;  %v5812_v46 = vld [vmem:[%s6733_s13 + $0x368] sm:$0xff]   ;;  %v5813_v47 = vld [vmem:[%s6733_s13 + $0x3e0] sm:$0xff]  }
 0x122   : > { %4916 = vmatprep.subr.bf16.mxu1 %v5744_v50  ;;  %v5816_v50 = vld [vmem:[%s6733_s13 + $0x3a0] sm:$0xff]  }
 0x123   : > { %4871 = vmatpush3.bf16.msra.mxu0 %v5738_v45  ;;  %v5810_v45 = vld [vmem:[%s6725_s3 + $0x2b4] ss:$108 sps:$4 sm:$0xff]  }
 0x124   : > { %4872 = vmatprep.subr.bf16.mxu0 %v5743_v49  ;;  %v5815_v49 = vld [vmem:[%s6733_s13 + $0x328] sm:$0xff]  }
 0x125   : > { %4917 = vmatpush3.bf16.msra.mxu1 %v5746_v52  ;;  %v5818_v52 = vld [vmem:[%s6733_s13 + $0x3e8] sm:$0xff]  }
 0x126   : > { %3045 = vmatmul.mubr.bf16.gmra.mrb[28].mxu0 %v5737_v44  ;;  %4918 = vmatprep.subr.bf16.mxu1 %v5753_v57  ;;  %v5809_v44 = vld [vmem:[%s6725_s3 + $0x2a8] ss:$108 sps:$4 sm:$0xff]  }
 0x127   : > { %3117 = vmatmul.mubr.bf16.gmra.mrb[28].mxu1 %v5742_v48  ;;  %4873 = vmatpush3.bf16.msra.mxu0 %v5745_v51  ;;  %v5814_v48 = vld [vmem:[%s6725_s3 + $0x2b0] ss:$108 sps:$4 sm:$0xff]   ;;  %v5821_v57 = vld [vmem:[%s6733_s13 + $0x3a8] sm:$0xff]  }
 0x128   : > { %3052 = vmatprep.mubr.bf16.mxu0 %v5747_v53  ;;  %3124 = vmatprep.mubr.bf16.mxu1 %v5750_v55  ;;  %v5817_v51 = vld [vmem:[%s6733_s13 + $0x370] sm:$0xff]  }
 0x129   : > { %4874 = vmatprep.subr.bf16.mxu0 %v5752_v56  ;;  %4919 = vmatpush3.bf16.msra.mxu1 %v5756_v60  ;;  %v475_v53 = vld [vmem:[%s6725_s3 + $0x380] sm:$0xff] }
 0x12a   : > { %4920 = vmatprep.subr.bf16.mxu1 %v5758_v62  ;;  %v5820_v55 = vld [vmem:[%s6733_s13 + $0x330] sm:$0xff]   ;;  %v4438_v56 = vcombine.low %v475_v53, %v475_v53  ;;  %v5826_v62 = vld [vmem:[%s6733_s13 + $0x378] sm:$0xff]  }
 0x12b   : > { %4875 = vmatpush3.bf16.msra.mxu0 %v5755_v59 }
 0x12c   : > { %4876 = vmatprep.subr.bf16.mxu0 %v5757_v61  ;;  %v5825_v61 = vld [vmem:[%s6733_s13 + $0x3f0] sm:$0xff]  }
 0x12d   : > { %4921 = vmatpush3.bf16.msra.mxu1 %v5761_v3  ;;  %v5832_v3 = vld [vmem:[%s6725_s3 + $0x34] ss:$108 sps:$4 sm:$0xff]  }
 0x12e   : > { %3053 = vmatmul.mubr.bf16.gmra.mrb[32].mxu0 %v5749_v54  ;;  %4922 = vmatprep.subr.bf16.mxu1 %v5765_v7  ;;  %v4439_v54 = vcombine.high %v475_v53, %v475_v53  ;;  %v5837_v7 = vld [vmem:[%s6725_s3 + $0x3c] ss:$108 sps:$4 sm:$0xff]  }
 0x12f   : > { %3125 = vmatmul.mubr.bf16.gmra.mrb[32].mxu1 %v5754_v58  ;;  %3060 = vmatprep.mubr.bf16.mxu0 %v4435_v0  ;;  %v476_v58 = vld [vmem:[%s6725_s3 + $0x388] sm:$0xff] }
 0x130   : > { %4877 = vmatpush3.bf16.msra.mxu0 %v5760_v1  ;;  %3132 = vmatprep.mubr.bf16.mxu1 %v4437_v5  ;;  %v4441_v59 = vcombine.high %v476_v58, %v476_v58  ;;  %v4440_v60 = vcombine.low %v476_v58, %v476_v58  ;;  %v5828_v0 = vld [vmem:[%s6733_s13 + $0x338] sm:$0xff]   ;;  %v5834_v5 = vld [vmem:[%s6733_s13 + $0x440] sm:$0xff]   ;;  %v5887_v53 = vld [vmem:[%s6733_s13 + $0x4b0] sm:$0xff]  }
 0x131   : > { %4878 = vmatprep.subr.bf16.mxu0 %v5766_v8  ;;  %4923 = vmatpush3.bf16.msra.mxu1 %v5767_v9  ;;  %v5829_v1 = vld [vmem:[%s6733_s13 + $0x3f8] sm:$0xff]   ;;  %v5838_v8 = vld [vmem:[%s6733_s13 + $0x400] sm:$0xff]   ;;  %v5839_v9 = vld [vmem:[%s6733_s13 + $0x448] sm:$0xff]  }
 0x132   : > { %4924 = vmatprep.subr.bf16.mxu1 %v5769_v11  ;;  %v5841_v11 = vld [vmem:[%s6733_s13 + $0x408] sm:$0xff]   ;;  %v5893_v58 = vld [vmem:[%s6733_s13 + $0x4b8] sm:$0xff]  }
 0x134   : > { %4879 = vmatpush3.bf16.msra.mxu0 %v5768_v10  ;;  %v5840_v10 = vld [vmem:[%s6733_s13 + $0x4c0] sm:$0xff]  }
 0x135   : > { %4925 = vmatpush3.bf16.msra.mxu1 %v5773_v14  ;;  %4956 = vmatprep.subr.bf16.mxu0 %v5774_v15  ;;  %v5845_v14 = vld [vmem:[%s6725_s3 + $0x108] ss:$108 sps:$4 sm:$0xff]  }
 0x136   : > { %3061 = vmatmul.mubr.bf16.gmra.mrb[36].mxu0 %v4434_v2  ;;  %5002 = vmatprep.subr.bf16.mxu1 %v5780_v20  ;;  %v5830_v2 = vld [vmem:[%s6725_s3 + $0x30] ss:$108 sps:$4 sm:$0xff]   ;;  %v5846_v15 = vld [vmem:[%s6725_s3 + $0x114] ss:$108 sps:$4 sm:$0xff]  }
 0x137   : > { %3133 = vmatmul.mubr.bf16.gmra.mrb[36].mxu1 %v4436_v6  ;;  %3172 = vmatprep.mubr.bf16.mxu0 %v5772_v13  ;;  %v5835_v6 = vld [vmem:[%s6725_s3 + $0x38] ss:$108 sps:$4 sm:$0xff]  }
 0x138   : > { %3244 = vmatprep.mubr.bf16.mxu1 %v5777_v17  ;;  %v5843_v13 = vld [vmem:[%s6725_s3 + $0x10c] ss:$108 sps:$4 sm:$0xff]  }
 0x139   : > { %v5849_v17 = vld [vmem:[%s6733_s13 + $0x450] sm:$0xff]   ;;  %v5852_v20 = vld [vmem:[%s6733_s13 + $0x488] sm:$0xff]  }
 0x13e   : > { %3173 = vmatmul.mubr.bf16.vlgmr.msra.gmra.mrb[40].mxu0 %v5770_v12  ;;  %v5842_v12 = vld [vmem:[%s6733_s13 + $0x480] sm:$0xff]  }
 0x13f   : > { %4957 = vmatpush3.bf16.msra.mxu0 %v5778_v18  ;;  %3245 = vmatmul.mubr.bf16.vlgmr.msra.gmra.mrb[40].mxu1 %v5775_v16  ;;  %v5848_v16 = vld [vmem:[%s6725_s3 + $0x110] ss:$108 sps:$4 sm:$0xff]   ;;  %v5850_v18 = vld [vmem:[%s6733_s13 + $0x4c8] sm:$0xff]  }
 0x140   : > { %4958 = vmatprep.subr.bf16.mxu0 %v5779_v19  ;;  %5003 = vmatpush3.bf16.msra.mxu1 %v5782_v22  ;;  %v5851_v19 = vld [vmem:[%s6733_s13 + $0x410] sm:$0xff]   ;;  %v5855_v22 = vld [vmem:[%s6733_s13 + $0x458] sm:$0xff]  }
 0x141   : > { %3180 = vmatprep.mubr.bf16.mxu0 %v5783_v23  ;;  %3252 = vmatprep.mubr.bf16.mxu1 %v5786_v25  ;;  %v5856_v23 = vld [vmem:[%s6733_s13 + $0x4d0] sm:$0xff]   ;;  %v5858_v25 = vld [vmem:[%s6733_s13 + $0x418] sm:$0xff]  }
 0x142   : > { %5004 = vmatprep.subr.bf16.mxu1 %v5790_v28  ;;  %v5862_v28 = vld [vmem:[%s6725_s3 + $0x1e8] ss:$108 sps:$4 sm:$0xff]  }
 0x143   : > { %4959 = vmatpush3.bf16.msra.mxu0 %v5781_v21  ;;  %v5853_v21 = vld [vmem:[%s6725_s3 + $0x1e4] ss:$108 sps:$4 sm:$0xff]  }
 0x144   : > { %4960 = vmatprep.subr.bf16.mxu0 %v5789_v27  ;;  %5005 = vmatpush3.bf16.msra.mxu1 %v5792_v30  ;;  %v5860_v27 = vld [vmem:[%s6725_s3 + $0x1ec] ss:$108 sps:$4 sm:$0xff]   ;;  %v5864_v30 = vld [vmem:[%s6733_s13 + $0x4d8] sm:$0xff]  }
 0x145   : > { %5006 = vmatprep.subr.bf16.mxu1 %v5796_v33  ;;  %v5867_v33 = vld [vmem:[%s6725_s3 + $0x2bc] ss:$108 sps:$4 sm:$0xff]  }
 0x146   : > { %3181 = vmatmul.mubr.bf16.gmra.mrb[44].mxu0 %v5785_v24  ;;  %v5857_v24 = vld [vmem:[%s6725_s3 + $0x1e0] ss:$108 sps:$4 sm:$0xff]  }
 0x147   : > { %3253 = vmatmul.mubr.bf16.gmra.mrb[44].mxu1 %v5788_v26  ;;  %4961 = vmatpush3.bf16.msra.mxu0 %v5791_v29  ;;  %v5859_v26 = vld [vmem:[%s6733_s13 + $0x490] sm:$0xff]   ;;  %v5863_v29 = vld [vmem:[%s6733_s13 + $0x460] sm:$0xff]  }
 0x148   : > { %3188 = vmatprep.mubr.bf16.mxu0 %v5793_v31  ;;  %4962 = vmatprep.subr.bf16.mxu0 %v5795_v32  ;;  %v5865_v31 = vld [vmem:[%s6733_s13 + $0x420] sm:$0xff]   ;;  %v5866_v32 = vld [vmem:[%s6733_s13 + $0x498] sm:$0xff]  }
 0x149   : > { %5007 = vmatpush3.bf16.msra.mxu1 %v5799_v36  ;;  %3260 = vmatprep.mubr.bf16.mxu1 %v5800_v37  ;;  %v5872_v36 = vld [vmem:[%s6733_s13 + $0x468] sm:$0xff]   ;;  %v5873_v37 = vld [vmem:[%s6733_s13 + $0x4e0] sm:$0xff]  }
 0x14a   : > { %5008 = vmatprep.subr.bf16.mxu1 %v5804_v40  ;;  %v5876_v40 = vld [vmem:[%s6733_s13 + $0x4a0] sm:$0xff]  }
 0x14b   : > { %4963 = vmatpush3.bf16.msra.mxu0 %v5798_v35  ;;  %v5870_v35 = vld [vmem:[%s6725_s3 + $0x2c4] ss:$108 sps:$4 sm:$0xff]  }
 0x14c   : > { %4964 = vmatprep.subr.bf16.mxu0 %v5803_v39  ;;  %v5875_v39 = vld [vmem:[%s6733_s13 + $0x428] sm:$0xff]  }
 0x14d   : > { %5009 = vmatpush3.bf16.msra.mxu1 %v5806_v42  ;;  %v5878_v42 = vld [vmem:[%s6733_s13 + $0x4e8] sm:$0xff]  }
 0x14e   : > { %3189 = vmatmul.mubr.bf16.gmra.mrb[48].mxu0 %v5797_v34  ;;  %5010 = vmatprep.subr.bf16.mxu1 %v5813_v47  ;;  %v5869_v34 = vld [vmem:[%s6725_s3 + $0x2b8] ss:$108 sps:$4 sm:$0xff]  }
 0x14f   : > { %3261 = vmatmul.mubr.bf16.gmra.mrb[48].mxu1 %v5802_v38  ;;  %4965 = vmatpush3.bf16.msra.mxu0 %v5805_v41  ;;  %v5874_v38 = vld [vmem:[%s6725_s3 + $0x2c0] ss:$108 sps:$4 sm:$0xff]  }
 0x150   : > { %3196 = vmatprep.mubr.bf16.mxu0 %v5807_v43  ;;  %3268 = vmatprep.mubr.bf16.mxu1 %v5810_v45  ;;  %v5877_v41 = vld [vmem:[%s6733_s13 + $0x470] sm:$0xff]   ;;  %v477_v43 = vld [vmem:[%s6725_s3 + $0x390] sm:$0xff] }
 0x151   : > { %4966 = vmatprep.subr.bf16.mxu0 %v5812_v46  ;;  %5011 = vmatpush3.bf16.msra.mxu1 %v5816_v50  ;;  %v5880_v45 = vld [vmem:[%s6733_s13 + $0x430] sm:$0xff]   ;;  %v4442_v46 = vcombine.low %v477_v43, %v477_v43  ;;  %v5881_v47 = vld [vmem:[%s6733_s13 + $0x4a8] sm:$0xff]  }
 0x152   : > { %5012 = vmatprep.subr.bf16.mxu1 %v5818_v52  ;;  %v5886_v52 = vld [vmem:[%s6733_s13 + $0x478] sm:$0xff]  }
 0x153   : > { %4967 = vmatpush3.bf16.msra.mxu0 %v5815_v49 }
 0x154   : > { %4968 = vmatprep.subr.bf16.mxu0 %v5817_v51  ;;  %v5885_v51 = vld [vmem:[%s6733_s13 + $0x4f0] sm:$0xff]  }
 0x155   : > { %5013 = vmatpush3.bf16.msra.mxu1 %v5821_v57  ;;  %v5892_v57 = vld [vmem:[%s6725_s3 + $0x44] ss:$108 sps:$4 sm:$0xff]  }
 0x156   : > { %3197 = vmatmul.mubr.bf16.gmra.mrb[52].mxu0 %v5809_v44  ;;  %5014 = vmatprep.subr.bf16.mxu1 %v5825_v61  ;;  %v4443_v44 = vcombine.high %v477_v43, %v477_v43  ;;  %v5897_v61 = vld [vmem:[%s6725_s3 + $0x4c] ss:$108 sps:$4 sm:$0xff]  }
 0x157   : > { %3269 = vmatmul.mubr.bf16.gmra.mrb[52].mxu1 %v5814_v48  ;;  %3204 = vmatprep.mubr.bf16.mxu0 %v4439_v54  ;;  %v478_v48 = vld [vmem:[%s6725_s3 + $0x398] sm:$0xff]  ;;  %v5888_v54 = vld [vmem:[%s6733_s13 + $0x438] sm:$0xff]  }
 0x158   : > { %4969 = vmatpush3.bf16.msra.mxu0 %v5820_v55  ;;  %3276 = vmatprep.mubr.bf16.mxu1 %v4441_v59  ;;  %v4445_v49 = vcombine.high %v478_v48, %v478_v48  ;;  %v4444_v50 = vcombine.low %v478_v48, %v478_v48  ;;  %v5889_v55 = vld [vmem:[%s6733_s13 + $0x4f8] sm:$0xff]   ;;  %v5894_v59 = vld [vmem:[%s6733_s13 + $0x540] sm:$0xff]   ;;  %v5947_v43 = vld [vmem:[%s6733_s13 + $0x5b0] sm:$0xff]  }
 0x159   : > { %4970 = vmatprep.subr.bf16.mxu0 %v5826_v62  ;;  %5015 = vmatpush3.bf16.msra.mxu1 %v5827_v63  ;;  %v5898_v62 = vld [vmem:[%s6733_s13 + $0x500] sm:$0xff]   ;;  %v5899_v63 = vld [vmem:[%s6733_s13 + $0x548] sm:$0xff]  }
 0x15a   : > { %5016 = vmatprep.subr.bf16.mxu1 %v5829_v1  ;;  %v5901_v1 = vld [vmem:[%s6733_s13 + $0x508] sm:$0xff]  }
 0x15b   : > { %v5952_v48 = vld [vmem:[%s6725_s3 + $0x54] ss:$108 sps:$4 sm:$0xff]  }
 0x15c   : > { %4971 = vmatpush3.bf16.msra.mxu0 %v5828_v0  ;;  %v5900_v0 = vld [vmem:[%s6733_s13 + $0x5c0] sm:$0xff]  }
 0x15d   : > { %5017 = vmatpush3.bf16.msra.mxu1 %v5833_v4  ;;  %5048 = vmatprep.subr.bf16.mxu0 %v5834_v5  ;;  %v5905_v4 = vld [vmem:[%s6725_s3 + $0x118] ss:$108 sps:$4 sm:$0xff]  }
 0x15e   : > { %3205 = vmatmul.mubr.bf16.gmra.mrb[56].mxu0 %v4438_v56  ;;  %5094 = vmatprep.subr.bf16.mxu1 %v5840_v10  ;;  %v5890_v56 = vld [vmem:[%s6725_s3 + $0x40] ss:$108 sps:$4 sm:$0xff]   ;;  %v5906_v5 = vld [vmem:[%s6725_s3 + $0x124] ss:$108 sps:$4 sm:$0xff]  }
 0x15f   : > { %3277 = vmatmul.mubr.bf16.gmra.mrb[56].mxu1 %v4440_v60  ;;  %3316 = vmatprep.mubr.bf16.mxu0 %v5832_v3  ;;  %v5895_v60 = vld [vmem:[%s6725_s3 + $0x48] ss:$108 sps:$4 sm:$0xff]  }
 0x160   : > { %3388 = vmatprep.mubr.bf16.mxu1 %v5837_v7  ;;  %v5903_v3 = vld [vmem:[%s6725_s3 + $0x11c] ss:$108 sps:$4 sm:$0xff]   ;;  %v5912_v10 = vld [vmem:[%s6733_s13 + $0x588] sm:$0xff]  }
 0x161   : > { %v5909_v7 = vld [vmem:[%s6733_s13 + $0x550] sm:$0xff]  }
 0x166   : > { %3317 = vmatmul.mubr.bf16.vlgmr.msra.gmra.mrb[60].mxu0 %v5830_v2  ;;  %v5902_v2 = vld [vmem:[%s6733_s13 + $0x580] sm:$0xff]  }
 0x167   : > { %5049 = vmatpush3.bf16.msra.mxu0 %v5838_v8  ;;  %3389 = vmatmul.mubr.bf16.vlgmr.msra.gmra.mrb[60].mxu1 %v5835_v6  ;;  %v5908_v6 = vld [vmem:[%s6725_s3 + $0x120] ss:$108 sps:$4 sm:$0xff]  }
 0x168   : > { %5050 = vmatprep.subr.bf16.mxu0 %v5839_v9  ;;  %5095 = vmatpush3.bf16.msra.mxu1 %v5842_v12  ;;  %v5910_v8 = vld [vmem:[%s6733_s13 + $0x5c8] sm:$0xff]   ;;  %v5911_v9 = vld [vmem:[%s6733_s13 + $0x510] sm:$0xff]   ;;  %v5915_v12 = vld [vmem:[%s6733_s13 + $0x558] sm:$0xff]  }
 0x169   : > { %3324 = vmatprep.mubr.bf16.mxu0 %v5843_v13  ;;  %3396 = vmatprep.mubr.bf16.mxu1 %v5846_v15  ;;  %v5916_v13 = vld [vmem:[%s6733_s13 + $0x5d0] sm:$0xff]   ;;  %v5918_v15 = vld [vmem:[%s6733_s13 + $0x518] sm:$0xff]  }
 0x16a   : > { %5096 = vmatprep.subr.bf16.mxu1 %v5850_v18  ;;  %v5922_v18 = vld [vmem:[%s6725_s3 + $0x1f8] ss:$108 sps:$4 sm:$0xff]  }
 0x16b   : > { %5051 = vmatpush3.bf16.msra.mxu0 %v5841_v11  ;;  %v5913_v11 = vld [vmem:[%s6725_s3 + $0x1f4] ss:$108 sps:$4 sm:$0xff]  }
 0x16c   : > { %5052 = vmatprep.subr.bf16.mxu0 %v5849_v17  ;;  %5097 = vmatpush3.bf16.msra.mxu1 %v5852_v20  ;;  %v5920_v17 = vld [vmem:[%s6725_s3 + $0x1fc] ss:$108 sps:$4 sm:$0xff]  }
 0x16d   : > { %5098 = vmatprep.subr.bf16.mxu1 %v5856_v23  ;;  %v5924_v20 = vld [vmem:[%s6733_s13 + $0x5d8] sm:$0xff]   ;;  %v5927_v23 = vld [vmem:[%s6725_s3 + $0x2cc] ss:$108 sps:$4 sm:$0xff]  }
 0x16e   : > { %3325 = vmatmul.mubr.bf16.gmra.mrb[64].mxu0 %v5845_v14  ;;  %v5917_v14 = vld [vmem:[%s6725_s3 + $0x1f0] ss:$108 sps:$4 sm:$0xff]  }
 0x16f   : > { %3397 = vmatmul.mubr.bf16.gmra.mrb[64].mxu1 %v5848_v16  ;;  %5053 = vmatpush3.bf16.msra.mxu0 %v5851_v19  ;;  %v5919_v16 = vld [vmem:[%s6733_s13 + $0x590] sm:$0xff]   ;;  %v5923_v19 = vld [vmem:[%s6733_s13 + $0x560] sm:$0xff]  }
 0x170   : > { %3332 = vmatprep.mubr.bf16.mxu0 %v5853_v21  ;;  %5054 = vmatprep.subr.bf16.mxu0 %v5855_v22  ;;  %v5925_v21 = vld [vmem:[%s6733_s13 + $0x520] sm:$0xff]   ;;  %v5926_v22 = vld [vmem:[%s6733_s13 + $0x598] sm:$0xff]  }
 0x171   : > { %5099 = vmatpush3.bf16.msra.mxu1 %v5859_v26  ;;  %3404 = vmatprep.mubr.bf16.mxu1 %v5860_v27  ;;  %v5932_v26 = vld [vmem:[%s6733_s13 + $0x568] sm:$0xff]   ;;  %v5933_v27 = vld [vmem:[%s6733_s13 + $0x5e0] sm:$0xff]  }
 0x172   : > { %5100 = vmatprep.subr.bf16.mxu1 %v5864_v30  ;;  %v5936_v30 = vld [vmem:[%s6733_s13 + $0x5a0] sm:$0xff]  }
 0x173   : > { %5055 = vmatpush3.bf16.msra.mxu0 %v5858_v25  ;;  %v5930_v25 = vld [vmem:[%s6725_s3 + $0x2d4] ss:$108 sps:$4 sm:$0xff]  }
 0x174   : > { %5056 = vmatprep.subr.bf16.mxu0 %v5863_v29  ;;  %v5935_v29 = vld [vmem:[%s6733_s13 + $0x528] sm:$0xff]  }
 0x175   : > { %5101 = vmatpush3.bf16.msra.mxu1 %v5866_v32  ;;  %v5938_v32 = vld [vmem:[%s6733_s13 + $0x5e8] sm:$0xff]  }
 0x176   : > { %3333 = vmatmul.mubr.bf16.gmra.mrb[68].mxu0 %v5857_v24  ;;  %5102 = vmatprep.subr.bf16.mxu1 %v5873_v37  ;;  %v5929_v24 = vld [vmem:[%s6725_s3 + $0x2c8] ss:$108 sps:$4 sm:$0xff]  }
 0x177   : > { %3405 = vmatmul.mubr.bf16.gmra.mrb[68].mxu1 %v5862_v28  ;;  %5057 = vmatpush3.bf16.msra.mxu0 %v5865_v31  ;;  %v5934_v28 = vld [vmem:[%s6725_s3 + $0x2d0] ss:$108 sps:$4 sm:$0xff]   ;;  %v5941_v37 = vld [vmem:[%s6733_s13 + $0x5a8] sm:$0xff]  }
 0x178   : > { %3340 = vmatprep.mubr.bf16.mxu0 %v5867_v33  ;;  %3412 = vmatprep.mubr.bf16.mxu1 %v5870_v35  ;;  %v5937_v31 = vld [vmem:[%s6733_s13 + $0x570] sm:$0xff]  }
 0x179   : > { %5058 = vmatprep.subr.bf16.mxu0 %v5872_v36  ;;  %5103 = vmatpush3.bf16.msra.mxu1 %v5876_v40  ;;  %v479_v33 = vld [vmem:[%s6725_s3 + $0x3a0] sm:$0xff] }
 0x17a   : > { %5104 = vmatprep.subr.bf16.mxu1 %v5878_v42  ;;  %v5940_v35 = vld [vmem:[%s6733_s13 + $0x530] sm:$0xff]   ;;  %v4446_v36 = vcombine.low %v479_v33, %v479_v33  ;;  %v5946_v42 = vld [vmem:[%s6733_s13 + $0x578] sm:$0xff]  }
 0x17b   : > { %5059 = vmatpush3.bf16.msra.mxu0 %v5875_v39 }
 0x17c   : > { %5060 = vmatprep.subr.bf16.mxu0 %v5877_v41  ;;  %v5945_v41 = vld [vmem:[%s6733_s13 + $0x5f0] sm:$0xff]  }
 0x17d   : > { %5105 = vmatpush3.bf16.msra.mxu1 %v5881_v47  ;;  %v5950_v47 = vld [vmem:[%s6725_s3 + $0x50] ss:$108 sps:$4 sm:$0xff]  }
 0x17e   : > { %3341 = vmatmul.mubr.bf16.gmra.mrb[72].mxu0 %v5869_v34  ;;  %5106 = vmatprep.subr.bf16.mxu1 %v5885_v51  ;;  %v4447_v34 = vcombine.high %v479_v33, %v479_v33  ;;  %v5976_v33 = vld [vmem:[%s6733_s13 + $0x690] sm:$0xff]  }
 0x17f   : > { %3413 = vmatmul.mubr.bf16.gmra.mrb[72].mxu1 %v5874_v38  ;;  %3348 = vmatprep.mubr.bf16.mxu0 %v4443_v44  ;;  %v480_v38 = vld [vmem:[%s6725_s3 + $0x3a8] sm:$0xff] }
 0x180   : > { %5061 = vmatpush3.bf16.msra.mxu0 %v5880_v45  ;;  %3420 = vmatprep.mubr.bf16.mxu1 %v4445_v49  ;;  %v4449_v39 = vcombine.high %v480_v38, %v480_v38  ;;  %v4448_v40 = vcombine.low %v480_v38, %v480_v38  ;;  %v5948_v44 = vld [vmem:[%s6733_s13 + $0x538] sm:$0xff]  }
 0x181   : > { %5062 = vmatprep.subr.bf16.mxu0 %v5886_v52  ;;  %5107 = vmatpush3.bf16.msra.mxu1 %v5887_v53  ;;  %v5949_v45 = vld [vmem:[%s6733_s13 + $0x5f8] sm:$0xff]   ;;  %v5954_v52 = vld [vmem:[%s6733_s13 + $0x640] sm:$0xff]  }
 0x182   : > { %5108 = vmatprep.subr.bf16.mxu1 %v5889_v55  ;;  %v5955_v55 = vld [vmem:[%s6725_s3 + $0x58] ss:$108 sps:$4 sm:$0xff]  }
 0x184   : > { %5063 = vmatpush3.bf16.msra.mxu0 %v5888_v54 }
 0x185   : > { %5109 = vmatpush3.bf16.msra.mxu1 %v5893_v58  ;;  %5140 = vmatprep.subr.bf16.mxu0 %v5894_v59  ;;  %v5957_v59 = vld [vmem:[%s6725_s3 + $0x5c] ss:$108 sps:$4 sm:$0xff]  }
 0x186   : > { %3349 = vmatmul.mubr.bf16.gmra.mrb[76].mxu0 %v4442_v46  ;;  %5186 = vmatprep.subr.bf16.mxu1 %v5900_v0  ;;  %v5959_v0 = vld [vmem:[%s6733_s13 + $0x648] sm:$0xff]  }
 0x187   : > { %3421 = vmatmul.mubr.bf16.gmra.mrb[76].mxu1 %v4444_v50  ;;  %3460 = vmatprep.mubr.bf16.mxu0 %v5892_v57  ;;  %v5953_v50 = vld [vmem:[%s6733_s13 + $0x5b8] sm:$0xff]  }
 0x188   : > { %3532 = vmatprep.mubr.bf16.mxu1 %v5897_v61  ;;  %v6348_v61 = vmov 0.0  }
 0x18e   : > { %3461 = vmatmul.mubr.bf16.vlgmr.msra.gmra.mrb[80].mxu0 %v5890_v56 }
 0x18f   : > { %5141 = vmatpush3.bf16.msra.mxu0 %v5898_v62  ;;  %3533 = vmatmul.mubr.bf16.vlgmr.msra.gmra.mrb[80].mxu1 %v5895_v60  ;;  %v5958_v60 = vld [vmem:[%s6733_s13 + $0x600] sm:$0xff]  }
 0x190   : > { %5142 = vmatprep.subr.bf16.mxu0 %v5899_v63  ;;  %5187 = vmatpush3.bf16.msra.mxu1 %v5902_v2 }
 0x191   : > { %3468 = vmatprep.mubr.bf16.mxu0 %v5903_v3  ;;  %3540 = vmatprep.mubr.bf16.mxu1 %v5906_v5  ;;  %v5960_v3 = vld [vmem:[%s6733_s13 + $0x608] sm:$0xff]  }
 0x192   : > { %5188 = vmatprep.subr.bf16.mxu1 %v5910_v8 }
 0x193   : > { %5143 = vmatpush3.bf16.msra.mxu0 %v5901_v1 }
 0x194   : > { %5144 = vmatprep.subr.bf16.mxu0 %v5909_v7  ;;  %5189 = vmatpush3.bf16.msra.mxu1 %v5912_v10  ;;  %v5964_v10 = vld [vmem:[%s6725_s3 + $0x128] ss:$108 sps:$4 sm:$0xff]  }
 0x195   : > { %5190 = vmatprep.subr.bf16.mxu1 %v5916_v13 }
 0x196   : > { %3469 = vmatmul.mubr.bf16.gmra.mrb[84].mxu0 %v5905_v4 }
 0x197   : > { %3541 = vmatmul.mubr.bf16.gmra.mrb[84].mxu1 %v5908_v6  ;;  %5145 = vmatpush3.bf16.msra.mxu0 %v5911_v9  ;;  %v5961_v6 = vld [vmem:[%s6733_s13 + $0x680] sm:$0xff]  }
 0x198   : > { %3476 = vmatprep.mubr.bf16.mxu0 %v5913_v11  ;;  %5146 = vmatprep.subr.bf16.mxu0 %v5915_v12  ;;  %v5962_v9 = vld [vmem:[%s6725_s3 + $0x12c] ss:$108 sps:$4 sm:$0xff]  }
 0x199   : > { %5191 = vmatpush3.bf16.msra.mxu1 %v5919_v16  ;;  %3548 = vmatprep.mubr.bf16.mxu1 %v5920_v17 }
 0x19a   : > { %5192 = vmatprep.subr.bf16.mxu1 %v5924_v20  ;;  %v5969_v20 = vld [vmem:[%s6733_s13 + $0x610] sm:$0xff]  }
 0x19b   : > { %5147 = vmatpush3.bf16.msra.mxu0 %v5918_v15  ;;  %v5967_v15 = vld [vmem:[%s6725_s3 + $0x130] ss:$108 sps:$4 sm:$0xff]  }
 0x19c   : > { %5148 = vmatprep.subr.bf16.mxu0 %v5923_v19 }
 0x19d   : > { %5193 = vmatpush3.bf16.msra.mxu1 %v5926_v22 }
 0x19e   : > { %3477 = vmatmul.mubr.bf16.gmra.mrb[88].mxu0 %v5917_v14  ;;  %5194 = vmatprep.subr.bf16.mxu1 %v5933_v27  ;;  %v5965_v14 = vld [vmem:[%s6725_s3 + $0x134] ss:$108 sps:$4 sm:$0xff]  }
 0x19f   : > { %3549 = vmatmul.mubr.bf16.gmra.mrb[88].mxu1 %v5922_v18  ;;  %5149 = vmatpush3.bf16.msra.mxu0 %v5925_v21  ;;  %v5968_v18 = vld [vmem:[%s6733_s13 + $0x650] sm:$0xff]  }
 0x1a0   : > { %3484 = vmatprep.mubr.bf16.mxu0 %v5927_v23  ;;  %3556 = vmatprep.mubr.bf16.mxu1 %v5930_v25  ;;  %v5970_v23 = vld [vmem:[%s6733_s13 + $0x688] sm:$0xff]  }
 0x1a1   : > { %5150 = vmatprep.subr.bf16.mxu0 %v5932_v26  ;;  %5195 = vmatpush3.bf16.msra.mxu1 %v5936_v30  ;;  %v5971_v26 = vld [vmem:[%s6725_s3 + $0x204] ss:$108 sps:$4 sm:$0xff]  }
 0x1a2   : > { %5196 = vmatprep.subr.bf16.mxu1 %v5938_v32 }
 0x1a3   : > { %5151 = vmatpush3.bf16.msra.mxu0 %v5935_v29  ;;  %v5974_v29 = vld [vmem:[%s6725_s3 + $0x200] ss:$108 sps:$4 sm:$0xff]  }
 0x1a4   : > { %5152 = vmatprep.subr.bf16.mxu0 %v5937_v31  ;;  %v5975_v31 = vld [vmem:[%s6733_s13 + $0x618] sm:$0xff]  }
 0x1a5   : > { %5197 = vmatpush3.bf16.msra.mxu1 %v5941_v37  ;;  %v5979_v37 = vld [vmem:[%s6725_s3 + $0x208] ss:$108 sps:$4 sm:$0xff]  }
 0x1a6   : > { %3485 = vmatmul.mubr.bf16.gmra.mrb[92].mxu0 %v5929_v24  ;;  %5198 = vmatprep.subr.bf16.mxu1 %v5945_v41  ;;  %v5981_v41 = vld [vmem:[%s6733_s13 + $0x620] sm:$0xff]  }
 0x1a7   : > { %3557 = vmatmul.mubr.bf16.gmra.mrb[92].mxu1 %v5934_v28  ;;  %3492 = vmatprep.mubr.bf16.mxu0 %v4447_v34  ;;  %v5973_v28 = vld [vmem:[%s6733_s13 + $0x658] sm:$0xff]  }
 0x1a8   : > { %5153 = vmatpush3.bf16.msra.mxu0 %v5940_v35  ;;  %3564 = vmatprep.mubr.bf16.mxu1 %v4449_v39  ;;  %v5980_v39 = vld [vmem:[%s6733_s13 + $0x660] sm:$0xff]  }
 0x1a9   : > { %5154 = vmatprep.subr.bf16.mxu0 %v5946_v42  ;;  %5199 = vmatpush3.bf16.msra.mxu1 %v5947_v43 }
 0x1aa   : > { %5200 = vmatprep.subr.bf16.mxu1 %v5949_v45 }
 0x1ac   : > { %5155 = vmatpush3.bf16.msra.mxu0 %v5948_v44  ;;  %v5982_v44 = vld [vmem:[%s6733_s13 + $0x698] sm:$0xff]  }
 0x1ad   : > { %5201 = vmatpush3.bf16.msra.mxu1 %v5953_v50  ;;  %5232 = vmatprep.subr.bf16.mxu0 %v5954_v52  ;;  %v5986_v52 = vld [vmem:[%s6725_s3 + $0x2e4] ss:$108 sps:$4 sm:$0xff]  }
 0x1ae   : > { %3493 = vmatmul.mubr.bf16.gmra.mrb[96].mxu0 %v4446_v36  ;;  %5316 = vmatprep.subr.bf16.mxu1 %v6348_v61  ;;  %v5977_v36 = vld [vmem:[%s6725_s3 + $0x20c] ss:$108 sps:$4 sm:$0xff]  }
 0x1af   : > { %3565 = vmatmul.mubr.bf16.gmra.mrb[96].mxu1 %v4448_v40  ;;  %3604 = vmatprep.mubr.bf16.mxu0 %v5952_v48  ;;  %v5985_v48 = vld [vmem:[%s6725_s3 + $0x2d8] ss:$108 sps:$4 sm:$0xff]  }
 0x1b0   : > { %3676 = vmatprep.mubr.bf16.mxu1 %v5957_v59 }
 0x1b6   : > { %3605 = vmatmul.mubr.bf16.vlgmr.msra.gmra.mrb[100].mxu0 %v5950_v47  ;;  %v5983_v47 = vld [vmem:[%s6725_s3 + $0x2dc] ss:$108 sps:$4 sm:$0xff]  }
 0x1b7   : > { %5233 = vmatpush3.bf16.msra.mxu0 %v5958_v60  ;;  %3677 = vmatmul.mubr.bf16.vlgmr.msra.gmra.mrb[100].mxu1 %v5955_v55  ;;  %v5991_v60 = vld [vmem:[%s6733_s13 + $0x6a0] sm:$0xff]  }
 0x1b8   : > { %5234 = vmatprep.subr.bf16.mxu0 %v5959_v0  ;;  %5317 = vmatpush3.bf16.msra.mxu1 %v5961_v6  ;;  %v5992_v0 = vld [vmem:[%s6733_s13 + $0x670] sm:$0xff]  }
 0x1b9   : > { %3612 = vmatprep.mubr.bf16.mxu0 %v5962_v9  ;;  %3684 = vmatprep.mubr.bf16.mxu1 %v5965_v14  ;;  %v5994_v6 = vld [vmem:[%s6733_s13 + $0x630] sm:$0xff]   ;;  %v5995_v9 = vld [vmem:[%s6733_s13 + $0x6a8] sm:$0xff]  }
 0x1ba   : > { %5318 = vmatprep.subr.bf16.mxu1 %v6348_v61 }
 0x1bb   : > { %5235 = vmatpush3.bf16.msra.mxu0 %v5960_v3 }
 0x1bc   : > { %5236 = vmatprep.subr.bf16.mxu0 %v5968_v18  ;;  %5319 = vmatpush3.bf16.msra.mxu1 %v5970_v23  ;;  %v6000_v18 = vld [vmem:[%s6733_s13 + $0x638] sm:$0xff]  }
 0x1bd   : > { %5320 = vmatprep.subr.bf16.mxu1 %v6348_v61 }
 0x1be   : > { %3613 = vmatmul.mubr.bf16.gmra.mrb[104].mxu0 %v5964_v10  ;;  %v482_v10 = vld [vmem:[%s6725_s3 + $0x3b8] sm:$0xff] }
 0x1bf   : > { %3685 = vmatmul.mubr.bf16.gmra.mrb[104].mxu1 %v5967_v15  ;;  %5237 = vmatpush3.bf16.msra.mxu0 %v5969_v20  ;;  %v4453_v15 = vcombine.high %v482_v10, %v482_v10 }
 0x1c0   : > { %3620 = vmatprep.mubr.bf16.mxu0 %v5971_v26  ;;  %5238 = vmatprep.subr.bf16.mxu0 %v5973_v28  ;;  %v6004_v28 = vld [vmem:[%s6725_s3 + $0x64] ss:$108 sps:$4 sm:$0xff]  }
 0x1c1   : > { %v4696_v46 = vpop.f32.mrb[0].mxu0  ;;  %5321 = vmatpush3.bf16.msra.mxu1 %v5976_v33  ;;  %3692 = vmatprep.mubr.bf16.mxu1 %v5977_v36 }
 0x1c2   : > { %v4742_v49 = vpop.f32.mrb[0].mxu1  ;;  %v4697_v51 = vpop.f32.mrb[1].mxu0  ;;  %5322 = vmatprep.subr.bf16.mxu1 %v6348_v61 }
 0x1c3   : > { %v4698_v53 = vadd.f32 %v4697_v51, %v4696_v46  ;;  %v4743_v54 = vpop.f32.mrb[1].mxu1  ;;  %v4699_v57 = vpop.f32.mrb[2].mxu0  ;;  %5239 = vmatpush3.bf16.msra.mxu0 %v5975_v31 }
 0x1c4   : > { %v4744_v56 = vadd.f32 %v4743_v54, %v4742_v49  ;;  %v4745_v58 = vpop.f32.mrb[2].mxu1  ;;  %v4700_v63 = vpop.f32.mrb[3].mxu0  ;;  %5240 = vmatprep.subr.bf16.mxu0 %v5980_v39  ;;  %v5988_v54 = vld [vmem:[%s6733_s13 + $0x668] sm:$0xff]  }
 0x1c5   : > { %v4701_v1 = vadd.f32 %v4700_v63, %v4699_v57  ;;  %v4746_v2 = vpop.f32.mrb[3].mxu1  ;;  %5323 = vmatpush3.bf16.msra.mxu1 %v5982_v44 }
 0x1c6   : > { %v7053_v62 = vadd.f32 %v4744_v56, %v4698_v53  ;;  %v4747_v4 = vadd.f32 %v4746_v2, %v4745_v58  ;;  %3621 = vmatmul.mubr.bf16.gmra.mrb[108].mxu0 %v5974_v29  ;;  %5324 = vmatprep.subr.bf16.mxu1 %v6348_v61  ;;  %v5989_v56 = vld [vmem:[%s6725_s3 + $0x2e0] ss:$108 sps:$4 sm:$0xff]  }
 0x1c7   : > { %3693 = vmatmul.mubr.bf16.gmra.mrb[108].mxu1 %v5979_v37  ;;  %5241 = vmatpush3.bf16.msra.mxu0 %v5981_v41  ;;  %v5990_v58 = vld [vmem:[%s6733_s13 + $0x628] sm:$0xff]  }
 0x1c8   : > { %v7060_v11 = vadd.f32 %v4747_v4, %v4701_v1  ;;  %3628 = vmatprep.mubr.bf16.mxu0 %v5983_v47  ;;  %3700 = vmatprep.mubr.bf16.mxu1 %v5986_v52  ;;  %v481_v1 = vld [vmem:[%s6725_s3 + $0x3b0] sm:$0xff] }
 0x1c9   : > { %v4702_v5 = vpop.f32.mrb[4].mxu0  ;;  %5242 = vmatprep.subr.bf16.mxu0 %v5988_v54  ;;  %5325 = vmatpush3.bf16.msra.mxu1 %v5991_v60  ;;  %v4450_v14 = vcombine.low %v481_v1, %v481_v1  ;;  %v6009_v54 = vld [vmem:[%s6725_s3 + $0x138] ss:$108 sps:$4 sm:$0xff]  }
 0x1ca   : > { %v4748_v7 = vpop.f32.mrb[4].mxu1  ;;  %v4703_v8 = vpop.f32.mrb[5].mxu0  ;;  %5326 = vmatprep.subr.bf16.mxu1 %v6348_v61 }
 0x1cb   : > { %v4704_v12 = vadd.f32 %v4703_v8, %v4702_v5  ;;  %v4749_v13 = vpop.f32.mrb[5].mxu1  ;;  %v4705_v17 = vpop.f32.mrb[6].mxu0  ;;  %5243 = vmatpush3.bf16.msra.mxu0 %v5990_v58  ;;  %v4451_v5 = vcombine.high %v481_v1, %v481_v1 }
 0x1cc   : > { %v4750_v16 = vadd.f32 %v4749_v13, %v4748_v7  ;;  %v4751_v19 = vpop.f32.mrb[6].mxu1  ;;  %v4706_v22 = vpop.f32.mrb[7].mxu0  ;;  %5244 = vmatprep.subr.bf16.mxu0 %v5992_v0  ;;  %v6010_v0 = vld [vmem:[%s6725_s3 + $0x140] ss:$108 sps:$4 sm:$0xff]  }
 0x1cd   : > { %v4707_v24 = vadd.f32 %v4706_v22, %v4705_v17  ;;  %v4752_v25 = vpop.f32.mrb[7].mxu1  ;;  %5327 = vmatpush3.bf16.msra.mxu1 %v5995_v9  ;;  %v6001_v22 = vld [vmem:[%s6733_s13 + $0x6b0] sm:$0xff]  }
 0x1ce   : > { %v7066_v21 = vadd.f32 %v4750_v16, %v4704_v12  ;;  %v4753_v27 = vadd.f32 %v4752_v25, %v4751_v19  ;;  %3629 = vmatmul.mubr.bf16.gmra.mrb[112].mxu0 %v5985_v48  ;;  %v5999_v16 = vld [vmem:[%s6733_s13 + $0x678] sm:$0xff]   ;;  %5328 = vmatprep.subr.bf16.mxu1 %v6348_v61 }
 0x1cf   : > { %3701 = vmatmul.mubr.bf16.gmra.mrb[112].mxu1 %v5989_v56  ;;  %3636 = vmatprep.mubr.bf16.mxu0 %v4451_v5 }
 0x1d0   : > { %v7073_v30 = vadd.f32 %v4753_v27, %v4707_v24  ;;  %5245 = vmatpush3.bf16.msra.mxu0 %v5994_v6  ;;  %3708 = vmatprep.mubr.bf16.mxu1 %v4453_v15  ;;  %v4452_v24 = vcombine.low %v482_v10, %v482_v10  ;;  %v6013_v10 = vld [vmem:[%s6725_s3 + $0x210] ss:$108 sps:$4 sm:$0xff]   ;;  %v6015_v15 = vld [vmem:[%s6725_s3 + $0x2ec] ss:$108 sps:$4 sm:$0xff]  }
 0x1d1   : > { %v4708_v32 = vpop.f32.mrb[8].mxu0  ;;  %5246 = vmatprep.subr.bf16.mxu0 %v5999_v16  ;;  %5329 = vmatpush3.bf16.msra.mxu1 %v6001_v22 }
 0x1d2   : > { %v4754_v34 = vpop.f32.mrb[8].mxu1  ;;  %v4709_v35 = vpop.f32.mrb[9].mxu0  ;;  %5330 = vmatprep.subr.bf16.mxu1 %v6348_v61 }
 0x1d3   : > { %v4710_v38 = vadd.f32 %v4709_v35, %v4708_v32  ;;  %v4755_v40 = vpop.f32.mrb[9].mxu1  ;;  %v4711_v43 = vpop.f32.mrb[10].mxu0  ;;  %v6005_v32 = vld [vmem:[%s6733_s13 + $0x6b8] sm:$0xff]  }
 0x1d4   : > { %v4756_v42 = vadd.f32 %v4755_v40, %v4754_v34  ;;  %v4757_v45 = vpop.f32.mrb[10].mxu1  ;;  %v4712_v46 = vpop.f32.mrb[11].mxu0  ;;  %5247 = vmatpush3.bf16.msra.mxu0 %v6000_v18  ;;  %v6007_v40 = vld [vmem:[%s6725_s3 + $0x13c] ss:$108 sps:$4 sm:$0xff]  }
 0x1d5   : > { %v4713_v50 = vadd.f32 %v4712_v46, %v4711_v43  ;;  %v4758_v51 = vpop.f32.mrb[11].mxu1  ;;  %5331 = vmatpush3.bf16.msra.mxu1 %v6005_v32 }
 0x1d6   : > { %v7086_v49 = vadd.f32 %v4756_v42, %v4710_v38  ;;  %v4759_v53 = vadd.f32 %v4758_v51, %v4757_v45  ;;  %3637 = vmatmul.mubr.bf16.gmra.mrb[116].mxu0 %v4450_v14  ;;  %v6002_v38 = vld [vmem:[%s6725_s3 + $0x60] ss:$108 sps:$4 sm:$0xff]   ;;  %v6006_v42 = vld [vmem:[%s6725_s3 + $0x68] ss:$108 sps:$4 sm:$0xff]  }
 0x1d7   : > { %3748 = vmatprep.mubr.bf16.mxu0 %v6004_v28  ;;  %3709 = vmatmul.mubr.bf16.gmra.mrb[116].mxu1 %v4452_v24  ;;  %v483_v28 = vld [vmem:[%s6725_s3 + $0x3c0] sm:$0xff] }
 0x1d8   : > { %v7092_v57 = vadd.f32 %v4759_v53, %v4713_v50  ;;  %5332 = vmatprep.mubr.msk.bf16.mxu1 %vm6349_vm0, %v6348_v61 }
 0x1d9   : > { %v4714_v55 = vpop.f32.mrb[12].mxu0 }
 0x1da   : > { %v4760_v59 = vpop.f32.mrb[12].mxu1  ;;  %v4715_v63 = vpop.f32.mrb[13].mxu0 }
 0x1db   : > { %v4716_v2 = vadd.f32 %v4715_v63, %v4714_v55  ;;  %v4761_v3 = vpop.f32.mrb[13].mxu1  ;;  %v4717_v4 = vpop.f32.mrb[14].mxu0 }
 0x1dc   : > { %v4762_v7 = vadd.f32 %v4761_v3, %v4760_v59  ;;  %v4763_v8 = vpop.f32.mrb[14].mxu1  ;;  %v4718_v12 = vpop.f32.mrb[15].mxu0  ;;  %v6011_v59 = vld [vmem:[%s6725_s3 + $0x214] ss:$108 sps:$4 sm:$0xff]  }
 0x1dd   : > { %v4764_v13 = vpop.f32.mrb[15].mxu1  ;;  %v4719_v19 = vadd.f32 %v4718_v12, %v4717_v4 }
 0x1de   : > { %v7103_v17 = vadd.f32 %v4762_v7, %v4716_v2  ;;  %v4765_v20 = vadd.f32 %v4764_v13, %v4763_v8  ;;  %3749 = vmatmul.mubr.bf16.vlgmr.msra.gmra.mrb[120].mxu0 %v6002_v38 }
 0x1df   : > { %3756 = vmatprep.mubr.bf16.mxu0 %v6007_v40  ;;  %5333 = vmatmul.mubr.bf16.vlgmr.msra.gmra.mrb[120].mxu1 %v6006_v42  ;;  %v6018_v40 = vld [vmem:[%s6725_s3 + $0x2f0] ss:$108 sps:$4 sm:$0xff]  }
 0x1e0   : > { %v7108_v25 = vadd.f32 %v4765_v20, %v4719_v19  ;;  %5336 = vmatprep.mubr.msk.bf16.mxu1 %vm6349_vm0, %v6348_v61 }
 0x1e1   : > { %v4720_v23 = vpop.f32.mrb[16].mxu0 }
 0x1e2   : > { %v4766_v26 = vpop.f32.mrb[16].mxu1  ;;  %v4721_v27 = vpop.f32.mrb[17].mxu0 }
 0x1e3   : > { %v4722_v29 = vadd.f32 %v4721_v27, %v4720_v23  ;;  %v4767_v31 = vpop.f32.mrb[17].mxu1  ;;  %v4723_v34 = vpop.f32.mrb[18].mxu0 }
 0x1e4   : > { %v4768_v33 = vadd.f32 %v4767_v31, %v4766_v26  ;;  %v4769_v35 = vpop.f32.mrb[18].mxu1  ;;  %v4724_v36 = vpop.f32.mrb[19].mxu0  ;;  %v6017_v31 = vld [vmem:[%s6725_s3 + $0x2e8] ss:$108 sps:$4 sm:$0xff]  }
 0x1e5   : > { %v4770_v37 = vpop.f32.mrb[19].mxu1  ;;  %v4455_v35 = vcombine.high %v483_v28, %v483_v28 }
 0x1e6   : > { %v7116_v39 = vadd.f32 %v4768_v33, %v4722_v29  ;;  %3757 = vmatmul.mubr.bf16.gmra.mrb[124].mxu0 %v6009_v54 }
 0x1e7   : > { %3764 = vmatprep.mubr.bf16.mxu0 %v6011_v59  ;;  %5337 = vmatmul.mubr.bf16.gmra.mrb[124].mxu1 %v6010_v0  ;;  %v6021_v59 = vld [vmem:[%s6725_s3 + $0x3c8] ss:$0 sps:$4 sm:$0xff]  }
 0x1e8   : > { %5340 = vmatprep.mubr.msk.bf16.mxu1 %vm6349_vm0, %v6348_v61 }
 0x1e9   : > { %v4788_v41 = vpop.f32.mrb[20].mxu0 }
 0x1ea   : > { %v4789_v43 = vpop.f32.mrb[21].mxu0  ;;  %v4834_v46 = vpop.f32.mrb[20].mxu1 }
 0x1eb   : > { %v4790_v44 = vadd.f32 %v4789_v43, %v4788_v41  ;;  %v4791_v45 = vpop.f32.mrb[22].mxu0  ;;  %v4835_v51 = vpop.f32.mrb[21].mxu1 }
 0x1ec   : > { %v4792_v47 = vpop.f32.mrb[23].mxu0  ;;  %v4836_v52 = vadd.f32 %v4835_v51, %v4834_v46  ;;  %v4837_v53 = vpop.f32.mrb[22].mxu1 }
 0x1ed   : > { %v3031_v48 = vadd.f32 %v4790_v44, %v7053_v62  ;;  %v4793_v50 = vadd.f32 %v4792_v47, %v4791_v45  ;;  %v4838_v56 = vpop.f32.mrb[23].mxu1  ;;  %v4454_v47 = vcombine.low %v483_v28, %v483_v28 }
 0x1ee   : > { %v4839_v60 = vadd.f32 %v4838_v56, %v4837_v53  ;;  %3765 = vmatmul.mubr.bf16.gmra.mrb[128].mxu0 %v6013_v10 }
 0x1ef   : > { %v3034_v55 = vadd.f32 %v4793_v50, %v7060_v11  ;;  %v7125_v58 = vadd.f32 %v4836_v52, %v3031_v48  ;;  %3772 = vmatprep.mubr.bf16.mxu0 %v6015_v15 }
 0x1f1   : > { %v4794_v63 = vpop.f32.mrb[24].mxu0  ;;  %v7129_v62 = vadd.f32 %v4839_v60, %v3034_v55 }
 0x1f2   : > { %v4795_v1 = vpop.f32.mrb[25].mxu0  ;;  %v4840_v4 = vpop.f32.mrb[24].mxu1 }
 0x1f3   : > { %v4796_v2 = vadd.f32 %v4795_v1, %v4794_v63  ;;  %v4797_v3 = vpop.f32.mrb[26].mxu0  ;;  %v4841_v7 = vpop.f32.mrb[25].mxu1 }
 0x1f4   : > { %v4798_v5 = vpop.f32.mrb[27].mxu0  ;;  %v4842_v8 = vadd.f32 %v4841_v7, %v4840_v4  ;;  %v4843_v9 = vpop.f32.mrb[26].mxu1 }
 0x1f5   : > { %v3039_v11 = vadd.f32 %v4796_v2, %v7066_v21  ;;  %v4799_v6 = vadd.f32 %v4798_v5, %v4797_v3  ;;  %v4844_v13 = vpop.f32.mrb[27].mxu1  ;;  %v6014_v21 = vld [vmem:[%s6725_s3 + $0x218] ss:$108 sps:$4 sm:$0xff]  }
 0x1f6   : > { %v4845_v16 = vadd.f32 %v4844_v13, %v4843_v9  ;;  %5341 = vmatmul.mubr.bf16.gmra.mrb[128].mxu1 %v6014_v21  ;;  %3773 = vmatmul.mubr.bf16.gmra.mrb[132].mxu0 %v6017_v31 }
 0x1f7   : > { %v3042_v12 = vadd.f32 %v4799_v6, %v7073_v30  ;;  %v7136_v14 = vadd.f32 %v4842_v8, %v3039_v11  ;;  %5344 = vmatprep.mubr.msk.bf16.mxu1 %vm6349_vm0, %v6348_v61  ;;  %3780 = vmatprep.mubr.bf16.mxu0 %v4455_v35 }
 0x1f9   : > { %v4800_v18 = vpop.f32.mrb[28].mxu0  ;;  %v7140_v19 = vadd.f32 %v4845_v16, %v3042_v12 }
 0x1fa   : > { %v4801_v20 = vpop.f32.mrb[29].mxu0  ;;  %v4846_v26 = vpop.f32.mrb[28].mxu1 }
 0x1fb   : > { %v4802_v22 = vadd.f32 %v4801_v20, %v4800_v18  ;;  %v4803_v23 = vpop.f32.mrb[30].mxu0  ;;  %v4847_v29 = vpop.f32.mrb[29].mxu1 }
 0x1fc   : > { %v4804_v24 = vpop.f32.mrb[31].mxu0  ;;  %v4848_v33 = vadd.f32 %v4847_v29, %v4846_v26  ;;  %v4849_v34 = vpop.f32.mrb[30].mxu1 }
 0x1fd   : > { %v3047_v30 = vadd.f32 %v4802_v22, %v7086_v49  ;;  %v4805_v27 = vadd.f32 %v4804_v24, %v4803_v23  ;;  %v4850_v36 = vpop.f32.mrb[31].mxu1 }
 0x1fe   : > { %v4851_v38 = vadd.f32 %v4850_v36, %v4849_v34  ;;  %5345 = vmatmul.mubr.bf16.gmra.mrb[132].mxu1 %v6018_v40  ;;  %3781 = vmatmul.mubr.bf16.gmra.mrb[136].mxu0 %v4454_v47 }
 0x1ff   : > { %v3050_v32 = vadd.f32 %v4805_v27, %v7092_v57  ;;  %v7148_v37 = vadd.f32 %v4848_v33, %v3047_v30  ;;  %5348 = vmatprep.mubr.msk.bf16.mxu1 %vm6349_vm0, %v6348_v61 }
 0x201   : > { %v7151_v49 = vadd.f32 %v4851_v38, %v3050_v32  ;;  %v4806_v41 = vpop.f32.mrb[32].mxu0 }
 0x202   : > { %v4807_v42 = vpop.f32.mrb[33].mxu0  ;;  %v4852_v45 = vpop.f32.mrb[32].mxu1 }
 0x203   : > { %v4808_v43 = vadd.f32 %v4807_v42, %v4806_v41  ;;  %v4809_v44 = vpop.f32.mrb[34].mxu0  ;;  %v4853_v46 = vpop.f32.mrb[33].mxu1 }
 0x204   : > { %v4810_v57 = vpop.f32.mrb[35].mxu0  ;;  %v4854_v51 = vadd.f32 %v4853_v46, %v4852_v45  ;;  %v4855_v52 = vpop.f32.mrb[34].mxu1 }
 0x205   : > { %v3055_v48 = vadd.f32 %v4808_v43, %v7103_v17  ;;  %v4811_v50 = vadd.f32 %v4810_v57, %v4809_v44  ;;  %v4856_v53 = vpop.f32.mrb[35].mxu1 }
 0x206   : > { %v4857_v56 = vadd.f32 %v4856_v53, %v4855_v52  ;;  %5349 = vmatmul.mubr.bf16.gmra.mrb[136].mxu1 %v6021_v59 }
 0x207   : > { %v3058_v54 = vadd.f32 %v4811_v50, %v7108_v25  ;;  %v7157_v55 = vadd.f32 %v4854_v51, %v3055_v48 }
 0x209   : > { %v7160_v60 = vadd.f32 %v4857_v56, %v3058_v54  ;;  %v4812_v63 = vpop.f32.mrb[36].mxu0 }
 0x20a   : > { %v4813_v0 = vpop.f32.mrb[37].mxu0  ;;  %v4858_v2 = vpop.f32.mrb[36].mxu1 }
 0x20b   : > { %v4814_v1 = vadd.f32 %v4813_v0, %v4812_v63  ;;  %v4815_v61 = vpop.f32.mrb[38].mxu0  ;;  %v4859_v3 = vpop.f32.mrb[37].mxu1 }
 0x20c   : > { %v4816_v17 = vpop.f32.mrb[39].mxu0  ;;  %v4860_v5 = vadd.f32 %v4859_v3, %v4858_v2  ;;  %v4861_v11 = vpop.f32.mrb[38].mxu1 }
 0x20d   : > { %v3063_v4 = vadd.f32 %v4814_v1, %v7116_v39  ;;  %v4862_v25 = vpop.f32.mrb[39].mxu1 }
 0x20f   : > { %v7163_v6 = vadd.f32 %v4860_v5, %v3063_v4 }
 0x211   : > { %v4880_v7 = vpop.f32.mrb[40].mxu0 }
 0x212   : > { %v4881_v8 = vpop.f32.mrb[41].mxu0  ;;  %v4926_v12 = vpop.f32.mrb[40].mxu1 }
 0x213   : > { %v4882_v9 = vadd.f32 %v4881_v8, %v4880_v7  ;;  %v4883_v10 = vpop.f32.mrb[42].mxu0  ;;  %v4927_v18 = vpop.f32.mrb[41].mxu1 }
 0x214   : > { %v4884_v13 = vpop.f32.mrb[43].mxu0  ;;  %v4928_v21 = vadd.f32 %v4927_v18, %v4926_v12  ;;  %v4929_v20 = vpop.f32.mrb[42].mxu1 }
 0x215   : > { %v3175_v15 = vadd.f32 %v4882_v9, %v7125_v58  ;;  %v4885_v16 = vadd.f32 %v4884_v13, %v4883_v10  ;;  %v4930_v39 = vpop.f32.mrb[43].mxu1 }
 0x216   : > { %v4931_v24 = vadd.f32 %v4930_v39, %v4929_v20 }
 0x217   : > { %v3178_v22 = vadd.f32 %v4885_v16, %v7129_v62  ;;  %v7167_v23 = vadd.f32 %v4928_v21, %v3175_v15 }
 0x219   : > { %v7169_v30 = vadd.f32 %v4931_v24, %v3178_v22  ;;  %v4886_v26 = vpop.f32.mrb[44].mxu0 }
 0x21a   : > { %v4887_v27 = vpop.f32.mrb[45].mxu0  ;;  %v4932_v31 = vpop.f32.mrb[44].mxu1 }
 0x21b   : > { %v4888_v28 = vadd.f32 %v4887_v27, %v4886_v26  ;;  %v4889_v29 = vpop.f32.mrb[46].mxu0  ;;  %v4933_v33 = vpop.f32.mrb[45].mxu1 }
 0x21c   : > { %v4890_v32 = vpop.f32.mrb[47].mxu0  ;;  %v4934_v35 = vadd.f32 %v4933_v33, %v4932_v31  ;;  %v4935_v36 = vpop.f32.mrb[46].mxu1 }
 0x21d   : > { %v3183_v58 = vadd.f32 %v4888_v28, %v7136_v14  ;;  %v4891_v34 = vadd.f32 %v4890_v32, %v4889_v29  ;;  %v4936_v38 = vpop.f32.mrb[47].mxu1 }
 0x21e   : > { %v4937_v41 = vadd.f32 %v4936_v38, %v4935_v36 }
 0x21f   : > { %v3186_v62 = vadd.f32 %v4891_v34, %v7140_v19  ;;  %v7173_v40 = vadd.f32 %v4934_v35, %v3183_v58 }
 0x221   : > { %v7175_v42 = vadd.f32 %v4937_v41, %v3186_v62  ;;  %v4892_v43 = vpop.f32.mrb[48].mxu0 }
 0x222   : > { %v4893_v44 = vpop.f32.mrb[49].mxu0  ;;  %v4938_v48 = vpop.f32.mrb[48].mxu1 }
 0x223   : > { %v4894_v45 = vadd.f32 %v4893_v44, %v4892_v43  ;;  %v4895_v57 = vpop.f32.mrb[50].mxu0  ;;  %v4939_v50 = vpop.f32.mrb[49].mxu1 }
 0x224   : > { %v4896_v46 = vpop.f32.mrb[51].mxu0  ;;  %v4940_v52 = vadd.f32 %v4939_v50, %v4938_v48  ;;  %v4941_v53 = vpop.f32.mrb[50].mxu1 }
 0x225   : > { %v3191_v47 = vadd.f32 %v4894_v45, %v7148_v37  ;;  %v4897_v14 = vadd.f32 %v4896_v46, %v4895_v57  ;;  %v4942_v19 = vpop.f32.mrb[51].mxu1 }
 0x226   : > { %v4943_v56 = vadd.f32 %v4942_v19, %v4941_v53 }
 0x227   : > { %v3194_v51 = vadd.f32 %v4897_v14, %v7151_v49  ;;  %v7179_v54 = vadd.f32 %v4940_v52, %v3191_v47 }
 0x229   : > { %v4898_v59 = vpop.f32.mrb[52].mxu0  ;;  %v7181_v63 = vadd.f32 %v4943_v56, %v3194_v51 }
 0x22a   : > { %v4899_v0 = vpop.f32.mrb[53].mxu0  ;;  %v4944_v2 = vpop.f32.mrb[52].mxu1 }
 0x22b   : > { %v4900_v1 = vadd.f32 %v4899_v0, %v4898_v59  ;;  %v4901_v61 = vpop.f32.mrb[54].mxu0  ;;  %v4945_v4 = vpop.f32.mrb[53].mxu1 }
 0x22c   : > { %v4902_v17 = vpop.f32.mrb[55].mxu0  ;;  %v4946_v5 = vadd.f32 %v4945_v4, %v4944_v2  ;;  %v4947_v49 = vpop.f32.mrb[54].mxu1 }
 0x22d   : > { %v3199_v37 = vadd.f32 %v4900_v1, %v7157_v55  ;;  %v4903_v3 = vadd.f32 %v4902_v17, %v4901_v61  ;;  %v4948_v25 = vpop.f32.mrb[55].mxu1 }
 0x22e   : > { %v4949_v8 = vadd.f32 %v4948_v25, %v4947_v49 }
 0x22f   : > { %v3202_v11 = vadd.f32 %v4903_v3, %v7160_v60  ;;  %v7185_v7 = vadd.f32 %v4946_v5, %v3199_v37 }
 0x231   : > { %v7187_v9 = vadd.f32 %v4949_v8, %v3202_v11  ;;  %v4904_v10 = vpop.f32.mrb[56].mxu0 }
 0x232   : > { %v4905_v12 = vpop.f32.mrb[57].mxu0  ;;  %v4950_v16 = vpop.f32.mrb[56].mxu1 }
 0x233   : > { %v4906_v13 = vadd.f32 %v4905_v12, %v4904_v10  ;;  %v4907_v15 = vpop.f32.mrb[58].mxu0  ;;  %v4951_v21 = vpop.f32.mrb[57].mxu1 }
 0x234   : > { %v4908_v18 = vpop.f32.mrb[59].mxu0  ;;  %v4952_v20 = vadd.f32 %v4951_v21, %v4950_v16  ;;  %v4953_v22 = vpop.f32.mrb[58].mxu1 }
 0x235   : > { %v3207_v55 = vadd.f32 %v4906_v13, %v7163_v6  ;;  %v4954_v39 = vpop.f32.mrb[59].mxu1 }
 0x237   : > { %v7190_v24 = vadd.f32 %v4952_v20, %v3207_v55 }
 0x239   : > { %v4972_v60 = vpop.f32.mrb[60].mxu0 }
 0x23a   : > { %v4973_v26 = vpop.f32.mrb[61].mxu0  ;;  %v5018_v29 = vpop.f32.mrb[60].mxu1 }
 0x23b   : > { %v4974_v27 = vadd.f32 %v4973_v26, %v4972_v60  ;;  %v4975_v28 = vpop.f32.mrb[62].mxu0  ;;  %v5019_v58 = vpop.f32.mrb[61].mxu1 }
 0x23c   : > { %v4976_v31 = vpop.f32.mrb[63].mxu0  ;;  %v5020_v34 = vadd.f32 %v5019_v58, %v5018_v29  ;;  %v5021_v35 = vpop.f32.mrb[62].mxu1 }
 0x23d   : > { %v3319_v32 = vadd.f32 %v4974_v27, %v7167_v23  ;;  %v4977_v33 = vadd.f32 %v4976_v31, %v4975_v28  ;;  %v5022_v6 = vpop.f32.mrb[63].mxu1 }
 0x23e   : > { %v5023_v62 = vadd.f32 %v5022_v6, %v5021_v35 }
 0x23f   : > { %v3322_v36 = vadd.f32 %v4977_v33, %v7169_v30  ;;  %v7194_v38 = vadd.f32 %v5020_v34, %v3319_v32 }
 0x241   : > { %v7196_v41 = vadd.f32 %v5023_v62, %v3322_v36  ;;  %v4978_v43 = vpop.f32.mrb[64].mxu0 }
 0x242   : > { %v4979_v44 = vpop.f32.mrb[65].mxu0  ;;  %v5024_v46 = vpop.f32.mrb[64].mxu1 }
 0x243   : > { %v4980_v45 = vadd.f32 %v4979_v44, %v4978_v43  ;;  %v4981_v57 = vpop.f32.mrb[66].mxu0  ;;  %v5025_v48 = vpop.f32.mrb[65].mxu1 }
 0x244   : > { %v4982_v47 = vpop.f32.mrb[67].mxu0  ;;  %v5026_v50 = vadd.f32 %v5025_v48, %v5024_v46  ;;  %v5027_v51 = vpop.f32.mrb[66].mxu1 }
 0x245   : > { %v3327_v23 = vadd.f32 %v4980_v45, %v7173_v40  ;;  %v4983_v14 = vadd.f32 %v4982_v47, %v4981_v57  ;;  %v5028_v52 = vpop.f32.mrb[67].mxu1 }
 0x246   : > { %v5029_v19 = vadd.f32 %v5028_v52, %v5027_v51 }
 0x247   : > { %v3330_v30 = vadd.f32 %v4983_v14, %v7175_v42  ;;  %v7200_v53 = vadd.f32 %v5026_v50, %v3327_v23 }
 0x249   : > { %v7202_v56 = vadd.f32 %v5029_v19, %v3330_v30  ;;  %v4984_v59 = vpop.f32.mrb[68].mxu0 }
 0x24a   : > { %v4985_v0 = vpop.f32.mrb[69].mxu0  ;;  %v5030_v37 = vpop.f32.mrb[68].mxu1 }
 0x24b   : > { %v4986_v1 = vadd.f32 %v4985_v0, %v4984_v59  ;;  %v4987_v61 = vpop.f32.mrb[70].mxu0  ;;  %v5031_v3 = vpop.f32.mrb[69].mxu1 }
 0x24c   : > { %v4988_v2 = vpop.f32.mrb[71].mxu0  ;;  %v5032_v5 = vadd.f32 %v5031_v3, %v5030_v37  ;;  %v5033_v49 = vpop.f32.mrb[70].mxu1 }
 0x24d   : > { %v3335_v17 = vadd.f32 %v4986_v1, %v7179_v54  ;;  %v4989_v40 = vadd.f32 %v4988_v2, %v4987_v61  ;;  %v5034_v42 = vpop.f32.mrb[71].mxu1 }
 0x24e   : > { %v5035_v25 = vadd.f32 %v5034_v42, %v5033_v49 }
 0x24f   : > { %v3338_v4 = vadd.f32 %v4989_v40, %v7181_v63  ;;  %v7206_v11 = vadd.f32 %v5032_v5, %v3335_v17 }
 0x251   : > { %v4990_v8 = vpop.f32.mrb[72].mxu0  ;;  %v7208_v10 = vadd.f32 %v5035_v25, %v3338_v4 }
 0x252   : > { %v4991_v12 = vpop.f32.mrb[73].mxu0  ;;  %v5036_v16 = vpop.f32.mrb[72].mxu1 }
 0x253   : > { %v4992_v13 = vadd.f32 %v4991_v12, %v4990_v8  ;;  %v4993_v15 = vpop.f32.mrb[74].mxu0  ;;  %v5037_v55 = vpop.f32.mrb[73].mxu1 }
 0x254   : > { %v4994_v18 = vpop.f32.mrb[75].mxu0  ;;  %v5038_v20 = vadd.f32 %v5037_v55, %v5036_v16  ;;  %v5039_v63 = vpop.f32.mrb[74].mxu1 }
 0x255   : > { %v3343_v54 = vadd.f32 %v4992_v13, %v7185_v7  ;;  %v4995_v21 = vadd.f32 %v4994_v18, %v4993_v15  ;;  %v5040_v39 = vpop.f32.mrb[75].mxu1 }
 0x256   : > { %v5041_v26 = vadd.f32 %v5040_v39, %v5039_v63 }
 0x257   : > { %v3346_v22 = vadd.f32 %v4995_v21, %v7187_v9  ;;  %v7212_v60 = vadd.f32 %v5038_v20, %v3343_v54 }
 0x259   : > { %v7214_v27 = vadd.f32 %v5041_v26, %v3346_v22  ;;  %v4996_v28 = vpop.f32.mrb[76].mxu0 }
 0x25a   : > { %v4997_v29 = vpop.f32.mrb[77].mxu0  ;;  %v5042_v33 = vpop.f32.mrb[76].mxu1 }
 0x25b   : > { %v4998_v31 = vadd.f32 %v4997_v29, %v4996_v28  ;;  %v4999_v32 = vpop.f32.mrb[78].mxu0  ;;  %v5043_v34 = vpop.f32.mrb[77].mxu1 }
 0x25c   : > { %v5000_v58 = vpop.f32.mrb[79].mxu0  ;;  %v5044_v35 = vadd.f32 %v5043_v34, %v5042_v33  ;;  %v5045_v36 = vpop.f32.mrb[78].mxu1 }
 0x25d   : > { %v3351_v7 = vadd.f32 %v4998_v31, %v7190_v24  ;;  %v5046_v6 = vpop.f32.mrb[79].mxu1 }
 0x25f   : > { %v7217_v62 = vadd.f32 %v5044_v35, %v3351_v7 }
 0x261   : > { %v5064_v9 = vpop.f32.mrb[80].mxu0 }
 0x262   : > { %v5065_v43 = vpop.f32.mrb[81].mxu0  ;;  %v5110_v57 = vpop.f32.mrb[80].mxu1 }
 0x263   : > { %v5066_v44 = vadd.f32 %v5065_v43, %v5064_v9  ;;  %v5067_v45 = vpop.f32.mrb[82].mxu0  ;;  %v5111_v23 = vpop.f32.mrb[81].mxu1 }
 0x264   : > { %v5068_v46 = vpop.f32.mrb[83].mxu0  ;;  %v5112_v14 = vadd.f32 %v5111_v23, %v5110_v57  ;;  %v5113_v50 = vpop.f32.mrb[82].mxu1 }
 0x265   : > { %v3463_v47 = vadd.f32 %v5066_v44, %v7194_v38  ;;  %v5069_v48 = vadd.f32 %v5068_v46, %v5067_v45  ;;  %v5114_v51 = vpop.f32.mrb[83].mxu1 }
 0x266   : > { %v5115_v30 = vadd.f32 %v5114_v51, %v5113_v50 }
 0x267   : > { %v3466_v24 = vadd.f32 %v5069_v48, %v7196_v41  ;;  %v7221_v52 = vadd.f32 %v5112_v14, %v3463_v47 }
 0x269   : > { %v7223_v19 = vadd.f32 %v5115_v30, %v3466_v24  ;;  %v5070_v59 = vpop.f32.mrb[84].mxu0 }
 0x26a   : > { %v5071_v0 = vpop.f32.mrb[85].mxu0  ;;  %v5116_v2 = vpop.f32.mrb[84].mxu1 }
 0x26b   : > { %v5072_v1 = vadd.f32 %v5071_v0, %v5070_v59  ;;  %v5073_v61 = vpop.f32.mrb[86].mxu0  ;;  %v5117_v37 = vpop.f32.mrb[85].mxu1 }
 0x26c   : > { %v5074_v17 = vpop.f32.mrb[87].mxu0  ;;  %v5118_v3 = vadd.f32 %v5117_v37, %v5116_v2  ;;  %v5119_v4 = vpop.f32.mrb[86].mxu1 }
 0x26d   : > { %v3471_v38 = vadd.f32 %v5072_v1, %v7200_v53  ;;  %v5075_v40 = vadd.f32 %v5074_v17, %v5073_v61  ;;  %v5120_v5 = vpop.f32.mrb[87].mxu1 }
 0x26e   : > { %v5121_v42 = vadd.f32 %v5120_v5, %v5119_v4 }
 0x26f   : > { %v3474_v41 = vadd.f32 %v5075_v40, %v7202_v56  ;;  %v7227_v49 = vadd.f32 %v5118_v3, %v3471_v38 }
 0x271   : > { %v7229_v25 = vadd.f32 %v5121_v42, %v3474_v41  ;;  %v5076_v8 = vpop.f32.mrb[88].mxu0 }
 0x272   : > { %v5077_v12 = vpop.f32.mrb[89].mxu0  ;;  %v5122_v54 = vpop.f32.mrb[88].mxu1 }
 0x273   : > { %v5078_v13 = vadd.f32 %v5077_v12, %v5076_v8  ;;  %v5079_v15 = vpop.f32.mrb[90].mxu0  ;;  %v5123_v21 = vpop.f32.mrb[89].mxu1 }
 0x274   : > { %v5080_v16 = vpop.f32.mrb[91].mxu0  ;;  %v5124_v20 = vadd.f32 %v5123_v21, %v5122_v54  ;;  %v5125_v63 = vpop.f32.mrb[90].mxu1 }
 0x275   : > { %v3479_v18 = vadd.f32 %v5078_v13, %v7206_v11  ;;  %v5081_v53 = vadd.f32 %v5080_v16, %v5079_v15  ;;  %v5126_v56 = vpop.f32.mrb[91].mxu1 }
 0x276   : > { %v5127_v39 = vadd.f32 %v5126_v56, %v5125_v63 }
 0x277   : > { %v3482_v55 = vadd.f32 %v5081_v53, %v7208_v10  ;;  %v7233_v22 = vadd.f32 %v5124_v20, %v3479_v18 }
 0x279   : > { %v7235_v26 = vadd.f32 %v5127_v39, %v3482_v55  ;;  %v5082_v28 = vpop.f32.mrb[92].mxu0 }
 0x27a   : > { %v5083_v29 = vpop.f32.mrb[93].mxu0  ;;  %v5128_v33 = vpop.f32.mrb[92].mxu1 }
 0x27b   : > { %v5084_v31 = vadd.f32 %v5083_v29, %v5082_v28  ;;  %v5085_v32 = vpop.f32.mrb[94].mxu0  ;;  %v5129_v11 = vpop.f32.mrb[93].mxu1 }
 0x27c   : > { %v5086_v58 = vpop.f32.mrb[95].mxu0  ;;  %v5130_v35 = vadd.f32 %v5129_v11, %v5128_v33  ;;  %v5131_v10 = vpop.f32.mrb[94].mxu1 }
 0x27d   : > { %v3487_v7 = vadd.f32 %v5084_v31, %v7212_v60  ;;  %v5087_v34 = vadd.f32 %v5086_v58, %v5085_v32  ;;  %v5132_v36 = vpop.f32.mrb[95].mxu1 }
 0x27e   : > { %v5133_v43 = vadd.f32 %v5132_v36, %v5131_v10 }
 0x27f   : > { %v3490_v6 = vadd.f32 %v5087_v34, %v7214_v27  ;;  %v7239_v9 = vadd.f32 %v5130_v35, %v3487_v7 }
 0x281   : > { %v7241_v44 = vadd.f32 %v5133_v43, %v3490_v6  ;;  %v5088_v45 = vpop.f32.mrb[96].mxu0 }
 0x282   : > { %v5089_v57 = vpop.f32.mrb[97].mxu0  ;;  %v5134_v48 = vpop.f32.mrb[96].mxu1 }
 0x283   : > { %v5090_v46 = vadd.f32 %v5089_v57, %v5088_v45  ;;  %v5091_v47 = vpop.f32.mrb[98].mxu0  ;;  %v5135_v14 = vpop.f32.mrb[97].mxu1 }
 0x284   : > { %v5092_v23 = vpop.f32.mrb[99].mxu0  ;;  %v5136_v50 = vadd.f32 %v5135_v14, %v5134_v48  ;;  %v5137_v24 = vpop.f32.mrb[98].mxu1 }
 0x285   : > { %v3495_v60 = vadd.f32 %v5090_v46, %v7217_v62  ;;  %v5138_v51 = vpop.f32.mrb[99].mxu1 }
 0x287   : > { %v7244_v30 = vadd.f32 %v5136_v50, %v3495_v60 }
 0x289   : > { %v5156_v27 = vpop.f32.mrb[100].mxu0 }
 0x28a   : > { %v5157_v59 = vpop.f32.mrb[101].mxu0  ;;  %v5202_v61 = vpop.f32.mrb[100].mxu1 }
 0x28b   : > { %v5158_v0 = vadd.f32 %v5157_v59, %v5156_v27  ;;  %v5159_v1 = vpop.f32.mrb[102].mxu0  ;;  %v5203_v38 = vpop.f32.mrb[101].mxu1 }
 0x28c   : > { %v5160_v2 = vpop.f32.mrb[103].mxu0  ;;  %v5204_v40 = vadd.f32 %v5203_v38, %v5202_v61  ;;  %v5205_v3 = vpop.f32.mrb[102].mxu1 }
 0x28d   : > { %v3607_v17 = vadd.f32 %v5158_v0, %v7221_v52  ;;  %v5161_v37 = vadd.f32 %v5160_v2, %v5159_v1  ;;  %v5206_v62 = vpop.f32.mrb[103].mxu1 }
 0x28e   : > { %v5207_v41 = vadd.f32 %v5206_v62, %v5205_v3 }
 0x28f   : > { %v3610_v4 = vadd.f32 %v5161_v37, %v7223_v19  ;;  %v7248_v5 = vadd.f32 %v5204_v40, %v3607_v17 }
 0x291   : > { %v5162_v42 = vpop.f32.mrb[104].mxu0  ;;  %v7250_v8 = vadd.f32 %v5207_v41, %v3610_v4 }
 0x292   : > { %v5163_v12 = vpop.f32.mrb[105].mxu0  ;;  %v5208_v16 = vpop.f32.mrb[104].mxu1 }
 0x293   : > { %v5164_v13 = vadd.f32 %v5163_v12, %v5162_v42  ;;  %v5165_v15 = vpop.f32.mrb[106].mxu0  ;;  %v5209_v53 = vpop.f32.mrb[105].mxu1 }
 0x294   : > { %v5166_v18 = vpop.f32.mrb[107].mxu0  ;;  %v5210_v21 = vadd.f32 %v5209_v53, %v5208_v16  ;;  %v5211_v55 = vpop.f32.mrb[106].mxu1  ;;  %v350_v53 = vld [vmem:[%s6752_s7] sm:$0xff] }
 0x295   : > { %v3615_v52 = vadd.f32 %v5164_v13, %v7227_v49  ;;  %v5167_v54 = vadd.f32 %v5166_v18, %v5165_v15  ;;  %v5212_v20 = vpop.f32.mrb[107].mxu1 }
 0x296   : > { %v5213_v56 = vadd.f32 %v5212_v20, %v5211_v55  ;;  %v351_v20 = vld [vmem:[%s6752_s7 + $0x8] sm:$0xff] }
 0x297   : > { %v3618_v19 = vadd.f32 %v5167_v54, %v7229_v25  ;;  %v7254_v63 = vadd.f32 %v5210_v21, %v3615_v52 }
 0x299   : > { %v5168_v39 = vpop.f32.mrb[108].mxu0  ;;  %v7256_v28 = vadd.f32 %v5213_v56, %v3618_v19 }
 0x29a   : > { %v5169_v29 = vpop.f32.mrb[109].mxu0  ;;  %v5214_v33 = vpop.f32.mrb[108].mxu1 }
 0x29b   : > { %v5170_v31 = vadd.f32 %v5169_v29, %v5168_v39  ;;  %v5171_v32 = vpop.f32.mrb[110].mxu0  ;;  %v5215_v7 = vpop.f32.mrb[109].mxu1 }
 0x29c   : > { %v5172_v58 = vpop.f32.mrb[111].mxu0  ;;  %v5216_v34 = vadd.f32 %v5215_v7, %v5214_v33  ;;  %v5217_v35 = vpop.f32.mrb[110].mxu1 }
 0x29d   : > { %v3623_v49 = vadd.f32 %v5170_v31, %v7233_v22  ;;  %v5173_v11 = vadd.f32 %v5172_v58, %v5171_v32  ;;  %v5218_v10 = vpop.f32.mrb[111].mxu1 }
 0x29e   : > { %v5219_v6 = vadd.f32 %v5218_v10, %v5217_v35 }
 0x29f   : > { %v3626_v25 = vadd.f32 %v5173_v11, %v7235_v26  ;;  %v7260_v36 = vadd.f32 %v5216_v34, %v3623_v49  ;;  %v352_v34 = vld [vmem:[%s6752_s7 + $0x10] sm:$0xff] }
 0x2a1   : > { %v5174_v43 = vpop.f32.mrb[112].mxu0  ;;  %v7262_v45 = vadd.f32 %v5219_v6, %v3626_v25 }
 0x2a2   : > { %v5175_v57 = vpop.f32.mrb[113].mxu0  ;;  %v5220_v48 = vpop.f32.mrb[112].mxu1 }
 0x2a3   : > { %v5176_v46 = vadd.f32 %v5175_v57, %v5174_v43  ;;  %v5177_v47 = vpop.f32.mrb[114].mxu0  ;;  %v5221_v60 = vpop.f32.mrb[113].mxu1  ;;  %v353_v43 = vld [vmem:[%s6752_s7 + $0x18] sm:$0xff] }
 0x2a4   : > { %v5178_v23 = vpop.f32.mrb[115].mxu0  ;;  %v5222_v50 = vadd.f32 %v5221_v60, %v5220_v48  ;;  %v5223_v24 = vpop.f32.mrb[114].mxu1 }
 0x2a5   : > { %v3631_v22 = vadd.f32 %v5176_v46, %v7239_v9  ;;  %v5179_v14 = vadd.f32 %v5178_v23, %v5177_v47  ;;  %v5224_v51 = vpop.f32.mrb[115].mxu1 }
 0x2a6   : > { %v5225_v59 = vadd.f32 %v5224_v51, %v5223_v24 }
 0x2a7   : > { %v3634_v26 = vadd.f32 %v5179_v14, %v7241_v44  ;;  %v7266_v27 = vadd.f32 %v5222_v50, %v3631_v22 }
 0x2a9   : > { %v5180_v0 = vpop.f32.mrb[116].mxu0  ;;  %v7268_v1 = vadd.f32 %v5225_v59, %v3634_v26  ;;  %v354_v26 = vld [vmem:[%s6752_s7 + $0x20] sm:$0xff] }
 0x2aa   : > { %v5181_v61 = vpop.f32.mrb[117].mxu0  ;;  %v5226_v37 = vpop.f32.mrb[116].mxu1 }
 0x2ab   : > { %v5182_v2 = vadd.f32 %v5181_v61, %v5180_v0  ;;  %v5183_v17 = vpop.f32.mrb[118].mxu0  ;;  %v5227_v40 = vpop.f32.mrb[117].mxu1 }
 0x2ac   : > { %v5184_v38 = vpop.f32.mrb[119].mxu0  ;;  %v5228_v3 = vadd.f32 %v5227_v40, %v5226_v37  ;;  %v5229_v4 = vpop.f32.mrb[118].mxu1 }
 0x2ad   : > { %v3639_v9 = vadd.f32 %v5182_v2, %v7244_v30  ;;  %v5230_v62 = vpop.f32.mrb[119].mxu1  ;;  %v355_v2 = vld [vmem:[%s6752_s7 + $0x28] sm:$0xff] }
 0x2af   : > { %v7271_v44 = vadd.f32 %v5228_v3, %v3639_v9 }
 0x2b1   : > { %v5248_v41 = vpop.f32.mrb[120].mxu0 }
 0x2b2   : > { %v5249_v42 = vpop.f32.mrb[121].mxu0  ;;  %v3822_v16 = vpop.f32.mrb[120].mxu1 }
 0x2b3   : > { %v5250_v12 = vadd.f32 %v5249_v42, %v5248_v41  ;;  %v5251_v13 = vpop.f32.mrb[122].mxu0  ;;  %v5334_v54 = vpop.f32.mrb[121].mxu1 }
 0x2b4   : > { %v5252_v15 = vpop.f32.mrb[123].mxu0  ;;  %v3825_v30 = vpop.f32.mrb[122].mxu1 }
 0x2b5   : > { %v5253_v18 = vadd.f32 %v5252_v15, %v5251_v13  ;;  %v3751_v52 = vadd.f32 %v5250_v12, %v7248_v5  ;;  %v5335_v19 = vpop.f32.mrb[123].mxu1  ;;  %v356_v12 = vld [vmem:[%s6752_s7 + $0x30] sm:$0xff] }
 0x2b7   : > { %v3823_v21 = vadd.f32 %v3822_v16, %v3751_v52  ;;  %v3754_v55 = vadd.f32 %v5253_v18, %v7250_v8  ;;  %v357_v52 = vld [vmem:[%s6752_s7 + $0x38] sm:$0xff] }
 0x2b9   : > { %v3860_v56 = vadd.f32 %v3823_v21, %v350_v53  ;;  %v3826_v39 = vadd.f32 %v3825_v30, %v3754_v55  ;;  %v5254_v29 = vpop.f32.mrb[124].mxu0 }
 0x2ba   : > { %v5255_v31 = vpop.f32.mrb[125].mxu0  ;;  %v3830_v49 = vpop.f32.mrb[124].mxu1 }
 0x2bb   : > { %3869 = vst [vmem:[%s6752_s7] sm:$0xff] %v3860_v56  ;;  %v3861_v32 = vadd.f32 %v3826_v39, %v351_v20  ;;  %v5256_v33 = vadd.f32 %v5255_v31, %v5254_v29  ;;  %v5257_v58 = vpop.f32.mrb[126].mxu0  ;;  %v5338_v8 = vpop.f32.mrb[125].mxu1  ;;  %v358_v31 = vld [vmem:[%s6752_s7 + $0x40] sm:$0xff] }
 0x2bc   : > { %v5258_v5 = vpop.f32.mrb[127].mxu0  ;;  %v3833_v35 = vpop.f32.mrb[126].mxu1 }
 0x2bd   : > { %3870 = vst [vmem:[%s6752_s7 + $0x8] sm:$0xff] %v3861_v32  ;;  %v5259_v11 = vadd.f32 %v5258_v5, %v5257_v58  ;;  %v3759_v7 = vadd.f32 %v5256_v33, %v7254_v63  ;;  %v5339_v6 = vpop.f32.mrb[127].mxu1  ;;  %v3916_v5 = vld [vmem:[#allocation8] sm:$0xff] (!%p4673_p13) }
 0x2bf   : > { %v3831_v25 = vadd.f32 %v3830_v49, %v3759_v7  ;;  %v3762_v10 = vadd.f32 %v5259_v11, %v7256_v28  ;;  %v3917_v49 = vld [vmem:[#allocation8 + $0x8] sm:$0xff] (!%p4673_p13)  ;;  %v3918_v11 = vld [vmem:[#allocation8 + $0x10] sm:$0xff] (!%p4673_p13)  ;;  %v6350_v7 = vmov (!%p4673_p13), 0.0|0.0  }
 0x2c0   : > { %5411 = vmatprep.subr.bf16.mxu0 (!%p4673_p13), %v6350_v7  ;;  %5435 = vmatprep.subr.bf16.mxu1 (!%p4673_p13), %v6350_v7  ;;  %v5412_v8 = vpack.c.bf16 (!%p4673_p13), %v3917_v49, %v3916_v5 }
 0x2c1   : > { %v3862_v57 = vadd.f32 %v3831_v25, %v352_v34  ;;  %v3834_v46 = vadd.f32 %v3833_v35, %v3762_v10  ;;  %v5260_v47 = vpop.f32.mrb[128].mxu0  ;;  %v3919_v34 = vld [vmem:[#allocation8 + $0x18] sm:$0xff] (!%p4673_p13)  ;;  %v3920_v25 = vld [vmem:[#allocation8 + $0x20] sm:$0xff] (!%p4673_p13)  ;;  %v3921_v10 = vld [vmem:[#allocation8 + $0x28] sm:$0xff] (!%p4673_p13) }
 0x2c2   : > { %v5261_v48 = vpop.f32.mrb[129].mxu0  ;;  %5413 = vmatpush3.bf16.msra.mxu0 (!%p4673_p13), %v5412_v8  ;;  %5443 = vmatpush3.bf16.msra.mxu1 (!%p4673_p13), %v5412_v8  ;;  %v5415_v35 = vpack.c.bf16 (!%p4673_p13), %v3919_v34, %v3918_v11  ;;  %v5418_v6 = vpack.c.bf16 (!%p4673_p13), %v3921_v10, %v3920_v25 }
 0x2c3   : > { %3871 = vst [vmem:[%s6752_s7 + $0x10] sm:$0xff] %v3862_v57  ;;  %v3863_v23 = vadd.f32 %v3834_v46, %v353_v43  ;;  %v5262_v22 = vadd.f32 %v5261_v48, %v5260_v47  ;;  %v5263_v14 = vpop.f32.mrb[130].mxu0  ;;  %5414 = vmatprep.subr.bf16.mxu0 (!%p4673_p13), %v6350_v7  ;;  %5436 = vmatprep.subr.bf16.mxu1 (!%p4673_p13), %v6350_v7  ;;  %v3922_v43 = vld [vmem:[#allocation8 + $0x30] sm:$0xff] (!%p4673_p13)  ;;  %v3923_v57 = vld [vmem:[#allocation8 + $0x38] sm:$0xff] (!%p4673_p13)  ;;  %v3924_v47 = vld [vmem:[#allocation8 + $0x40] sm:$0xff] (!%p4673_p13) }
 0x2c4   : > { %v5264_v63 = vpop.f32.mrb[131].mxu0  ;;  %v5421_v46 = vpack.c.bf16 (!%p4673_p13), %v3923_v57, %v3922_v43  ;;  %v3925_v48 = vld [vmem:[#allocation8 + $0x48] sm:$0xff] (!%p4673_p13) }
 0x2c5   : > { %3872 = vst [vmem:[%s6752_s7 + $0x18] sm:$0xff] %v3863_v23  ;;  %v5265_v50 = vadd.f32 %v5264_v63, %v5263_v14  ;;  %v3767_v24 = vadd.f32 %v5262_v22, %v7260_v36  ;;  %v5424_v23 = vpack.c.bf16 (!%p4673_p13), %v3925_v48, %v3924_v47  ;;  %v3926_v22 = vld [vmem:[#allocation8 + $0x50] sm:$0xff] (!%p4673_p13)  ;;  %v3927_v14 = vld [vmem:[#allocation8 + $0x58] sm:$0xff] (!%p4673_p13) }
 0x2c6   : > { %5416 = vmatpush3.bf16.msra.mxu0 (!%p4673_p13), %v5415_v35  ;;  %5444 = vmatpush3.bf16.msra.mxu1 (!%p4673_p13), %v5415_v35  ;;  %v5427_v63 = vpack.c.bf16 (!%p4673_p13), %v3927_v14, %v3926_v22 }
 0x2c7   : > { %v3770_v0 = vadd.f32 %v5265_v50, %v7262_v45  ;;  %5417 = vmatprep.subr.bf16.mxu0 (!%p4673_p13), %v6350_v7  ;;  %5437 = vmatprep.subr.bf16.mxu1 (!%p4673_p13), %v6350_v7  ;;  %v3929_v50 = vld [vmem:[#allocation8 + $0x68] sm:$0xff] (!%p4673_p13) }
 0x2c9   : > { %v3838_v60 = vpop.f32.mrb[128].mxu1  ;;  %v5266_v38 = vpop.f32.mrb[132].mxu0 }
 0x2ca   : > { %v5342_v28 = vpop.f32.mrb[129].mxu1  ;;  %v3839_v59 = vadd.f32 %v3838_v60, %v3767_v24  ;;  %v5267_v9 = vpop.f32.mrb[133].mxu0  ;;  %5419 = vmatpush3.bf16.msra.mxu0 (!%p4673_p13), %v5418_v6  ;;  %5445 = vmatpush3.bf16.msra.mxu1 (!%p4673_p13), %v5418_v6  ;;  %v3928_v60 = vld [vmem:[#allocation8 + $0x60] sm:$0xff] (!%p4673_p13) }
 0x2cb   : > { %v3841_v51 = vpop.f32.mrb[130].mxu1  ;;  %v5268_v3 = vadd.f32 %v5267_v9, %v5266_v38  ;;  %v5269_v4 = vpop.f32.mrb[134].mxu0  ;;  %5420 = vmatprep.subr.bf16.mxu0 (!%p4673_p13), %v6350_v7  ;;  %5438 = vmatprep.subr.bf16.mxu1 (!%p4673_p13), %v6350_v7  ;;  %v5430_v24 = vpack.c.bf16 (!%p4673_p13), %v3929_v50, %v3928_v60  ;;  %v3882_v28 = vld [vmem:[%s6752_s7] sm:$0xff] (!%p4673_p13) }
 0x2cc   : > { %v5343_v61 = vpop.f32.mrb[131].mxu1  ;;  %v3864_v17 = vadd.f32 %v3839_v59, %v354_v26  ;;  %v3842_v37 = vadd.f32 %v3841_v51, %v3770_v0  ;;  %v5270_v36 = vpop.f32.mrb[135].mxu0  ;;  %v4674_v26 = vld [vmem:[%s294_s25] ss:$0 sm:$0xff] (!%p4673_p13)  ;;  %v3930_v59 = vld [vmem:[#allocation8 + $0x70] sm:$0xff] (!%p4673_p13)  ;;  %v3931_v0 = vld [vmem:[#allocation8 + $0x78] sm:$0xff] (!%p4673_p13) }
 0x2cd   : > { %v5271_v41 = vadd.f32 %v5270_v36, %v5269_v4  ;;  %v3775_v42 = vadd.f32 %v5268_v3, %v7266_v27  ;;  %v7309_v61 = vadd.f32 (!%p4673_p13), %v4674_v26, %v3882_v28  ;;  %v3884_v36 = vld [vmem:[%s6752_s7 + $0x10] sm:$0xff] (!%p4673_p13) }
 0x2ce   : > { %3873 = vst [vmem:[%s6752_s7 + $0x20] sm:$0xff] %v3864_v17  ;;  %v3865_v40 = vadd.f32 %v3842_v37, %v355_v2  ;;  %5422 = vmatpush3.bf16.msra.mxu0 (!%p4673_p13), %v5421_v46  ;;  %5446 = vmatpush3.bf16.msra.mxu1 (!%p4673_p13), %v5421_v46  ;;  %v5433_v17 = vpack.c.bf16 (!%p4673_p13), %v3931_v0, %v3930_v59  ;;  %v3883_v37 = vld [vmem:[%s6752_s7 + $0x8] sm:$0xff] (!%p4673_p13) }
 0x2cf   : > { %v3778_v16 = vadd.f32 %v5271_v41, %v7268_v1  ;;  %5423 = vmatprep.subr.bf16.mxu0 (!%p4673_p13), %v6350_v7  ;;  %5439 = vmatprep.subr.bf16.mxu1 (!%p4673_p13), %v6350_v7  ;;  %v3907_v9 = vmul.f32 (!%p4673_p13), %v7309_v61, %v7309_v61  ;;  %v7319_v3 = vadd.f32 (!%p4673_p13), %v4674_v26, %v3883_v37 }
 0x2d0   : > { %3874 = vst [vmem:[%s6752_s7 + $0x28] sm:$0xff] %v3865_v40  ;;  %v7325_v41 = vadd.f32 (!%p4673_p13), %v4674_v26, %v3884_v36 }
 0x2d1   : > { %v3846_v62 = vpop.f32.mrb[132].mxu1  ;;  %v5272_v30 = vpop.f32.mrb[136].mxu0 }
 0x2d2   : > { %v5346_v45 = vpop.f32.mrb[133].mxu1  ;;  %v3847_v15 = vadd.f32 %v3846_v62, %v3775_v42  ;;  %v5273_v21 = vpop.f32.mrb[137].mxu0  ;;  %5425 = vmatpush3.bf16.msra.mxu0 (!%p4673_p13), %v5424_v23  ;;  %5447 = vmatpush3.bf16.msra.mxu1 (!%p4673_p13), %v5424_v23  ;;  %v3908_v42 = vmul.f32 (!%p4673_p13), %v7319_v3, %v7319_v3 }
 0x2d3   : > { %v3849_v13 = vpop.f32.mrb[134].mxu1  ;;  %v5274_v19 = vadd.f32 %v5273_v21, %v5272_v30  ;;  %v5275_v20 = vpop.f32.mrb[138].mxu0  ;;  %5426 = vmatprep.subr.bf16.mxu0 (!%p4673_p13), %v6350_v7  ;;  %5440 = vmatprep.subr.bf16.mxu1 (!%p4673_p13), %v6350_v7 }
 0x2d4   : > { %v5347_v18 = vpop.f32.mrb[135].mxu1  ;;  %v3866_v54 = vadd.f32 %v3847_v15, %v356_v12  ;;  %v3850_v53 = vadd.f32 %v3849_v13, %v3778_v16  ;;  %v5276_v27 = vpop.f32.mrb[139].mxu0  ;;  %v3885_v13 = vld [vmem:[%s6752_s7 + $0x18] sm:$0xff] (!%p4673_p13) }
 0x2d5   : > { %v3783_v39 = vadd.f32 %v5274_v19, %v7271_v44  ;;  %v6352_v44 = vmov (!%p4673_p13), 0.0   ;;  %v7339_v16 = vadd.f32 (!%p4673_p13), %v4674_v26, %v3885_v13  ;;  %v3909_v18 = vmul.f32 (!%p4673_p13), %v7325_v41, %v7325_v41 }
 0x2d6   : > { %3875 = vst [vmem:[%s6752_s7 + $0x30] sm:$0xff] %v3866_v54  ;;  %v3867_v55 = vadd.f32 %v3850_v53, %v357_v52  ;;  %5384 = vmatprep.mubr.msk.f32.mxu0 (!%p4673_p13), %vm6351_vm1, %v6352_v44  ;;  %5399 = vmatprep.mubr.msk.f32.mxu1 (!%p4673_p13), %vm6351_vm1, %v6352_v44  ;;  %v3886_v53 = vld [vmem:[%s6752_s7 + $0x20] sm:$0xff] (!%p4673_p13) }
 0x2d7   : > { %5428 = vmatpush3.bf16.msra.mxu0 (!%p4673_p13), %v5427_v63  ;;  %5448 = vmatpush3.bf16.msra.mxu1 (!%p4673_p13), %v5427_v63  ;;  %v3887_v51 = vld [vmem:[%s6752_s7 + $0x28] sm:$0xff] (!%p4673_p13)  ;;  %v3910_v30 = vmul.f32 (!%p4673_p13), %v7339_v16, %v7339_v16 }
 0x2d8   : > { %3876 = vst [vmem:[%s6752_s7 + $0x38] sm:$0xff] %v3867_v55  ;;  %3881 = sbr.rel (%p4673_p13) target bundleno = 986 (0x3da), region = 60  ;;  %5429 = vmatprep.subr.bf16.mxu0 (!%p4673_p13), %v6350_v7  ;;  %5441 = vmatprep.subr.bf16.mxu1 (!%p4673_p13), %v6350_v7  ;;  %v7311_v2 = vadd.f32 (!%p4673_p13), %v4674_v26, %v3887_v51  ;;  %v7356_v55 = vadd.f32 (!%p4673_p13), %v4674_v26, %v3886_v53 }
 0x2d9   : > { %v3854_v56 = vpop.f32.mrb[136].mxu1 }
 0x2da   : > { %v5350_v29 = vpop.f32.mrb[137].mxu1  ;;  %v3855_v32 = vadd.f32 %v3854_v56, %v3783_v39  ;;  %v3912_v40 = vmul.f32 (!%p4673_p13), %v7311_v2, %v7311_v2  ;;  %v3911_v19 = vmul.f32 (!%p4673_p13), %v7356_v55, %v7356_v55 }
 0x2db   : > { %v3857_v1 = vpop.f32.mrb[138].mxu1  ;;  %5431 = vmatpush3.bf16.msra.mxu0 (!%p4673_p13), %v5430_v24  ;;  %5449 = vmatpush3.bf16.msra.mxu1 (!%p4673_p13), %v5430_v24 }
 0x2dc   : > { %v5351_v33 = vpop.f32.mrb[139].mxu1  ;;  %v3868_v58 = vadd.f32 %v3855_v32, %v358_v31  ;;  %5432 = vmatprep.subr.bf16.mxu0 (!%p4673_p13), %v6350_v7  ;;  %5442 = vmatprep.subr.bf16.mxu1 (!%p4673_p13), %v6350_v7 }
 0x2dd   : > { %v3888_v38 = vld [vmem:[%s6752_s7 + $0x30] sm:$0xff] (!%p4673_p13) }
 0x2de   : > { %3877 = vst [vmem:[%s6752_s7 + $0x40] sm:$0xff] %v3868_v58  ;;  %v7321_v4 = vadd.f32 (!%p4673_p13), %v4674_v26, %v3888_v38 }
 0x2df   : > { %5434 = vmatpush3.bf16.msra.mxu0 %v5433_v17  ;;  %5450 = vmatpush3.bf16.msra.mxu1 %v5433_v17  ;;  %v3889_v62 = vld [vmem:[%s6752_s7 + $0x38] sm:$0xff] }
 0x2e0   : > { %v3913_v45 = vmul.f32 %v7321_v4, %v7321_v4  ;;  %v7331_v12 = vadd.f32 %v4674_v26, %v3889_v62 }
 0x2e2   : > { %5385 = vmatmul.mubr.f32.vlgmr.msra.gmra.mrb[0].mxu0 %v3907_v9  ;;  %5400 = vmatmul.mubr.f32.vlgmr.msra.gmra.mrb[0].mxu1 %v3912_v40  ;;  %v3914_v52 = vmul.f32 %v7331_v12, %v7331_v12 }
 0x2e3   : > { %5387 = vmatprep.mubr.msk.f32.mxu0 %vm6351_vm1, %v6352_v44  ;;  %5402 = vmatprep.mubr.msk.f32.mxu1 %vm6351_vm1, %v6352_v44 }
 0x2e5   : > { %v3890_v15 = vld [vmem:[%s6752_s7 + $0x40] sm:$0xff] }
 0x2e6   : > { %5388 = vmatmul.mubr.f32.gmra.mrb[2].mxu0 %v3908_v42  ;;  %5403 = vmatmul.mubr.f32.gmra.mrb[2].mxu1 %v3913_v45  ;;  %v7345_v54 = vadd.f32 %v4674_v26, %v3890_v15 }
 0x2e7   : > { %5390 = vmatprep.mubr.msk.f32.mxu0 %vm6351_vm1, %v6352_v44  ;;  %5405 = vmatprep.mubr.msk.f32.mxu1 %vm6351_vm1, %v6352_v44 }
 0x2e8   : > { %v3915_v21 = vmul.f32 %v7345_v54, %v7345_v54 }
 0x2ea   : > { %5391 = vmatmul.mubr.f32.gmra.mrb[4].mxu0 %v3909_v18  ;;  %5406 = vmatmul.mubr.f32.gmra.mrb[4].mxu1 %v3914_v52 }
 0x2eb   : > { %5393 = vmatprep.mubr.msk.f32.mxu0 %vm6351_vm1, %v6352_v44  ;;  %5408 = vmatprep.mubr.msk.f32.mxu1 %vm6351_vm1, %v6352_v44 }
 0x2ee   : > { %5394 = vmatmul.mubr.f32.gmra.mrb[6].mxu0 %v3910_v30  ;;  %5409 = vmatmul.mubr.f32.gmra.mrb[6].mxu1 %v3915_v21 }
 0x2ef   : > { %5396 = vmatprep.mubr.msk.f32.mxu0 %vm6351_vm1, %v6352_v44 }
 0x2f2   : > { %5397 = vmatmul.mubr.f32.gmra.mrb[8].mxu0 %v3911_v19 }
 0x3b5   : > { %v3998_v20 = vpop.f32.mrb[0].mxu0  ;;  %v4023_v27 = vpop.f32.mrb[0].mxu1 }
 0x3b6   : > { %6022 = vrsqrt.f32 %v3998_v20  ;;  %v5386_v56 = vpop.f32.mrb[1].mxu0  ;;  %v5401_v39 = vpop.f32.mrb[1].mxu1  ;;  %v4105_v29 = vadd.f32 1.0, %v3998_v20  ;;  %v4110_v31 = vadd.f32 1.0, %v4023_v27  ;;  %vm4044_vm2 = vcmp.eq.f32.partialorder %v3998_v20, inf }
 0x3b7   : > { %6024 = vrsqrt.f32 %v4023_v27  ;;  %vm4046_vm3 = vcmp.eq.f32.partialorder %v3998_v20, 0.0  ;;  %v4047_v43 = vand.u32 2147483648, %v3998_v20  ;;  %vm4079_vm4 = vcmp.eq.f32.partialorder %v4023_v27, inf }
 0x3b8   : > { %6026 = vrcp.f32 %v4105_v29  ;;  %vm4081_vm5 = vcmp.eq.f32.partialorder %v4023_v27, 0.0  ;;  %v4082_v48 = vand.u32 2147483648, %v4023_v27 }
 0x3b9   : > { %v7366_v1 = vpop.f32.mrb[2].mxu0  ;;  %v7368_v32 = vpop.f32.mrb[2].mxu1  ;;  %6028 = vrcp.f32 %v4110_v31 }
 0x3ba   : > { %v5389_v33 = vpop.f32.mrb[3].mxu0  ;;  %v5404_v58 = vpop.f32.mrb[3].mxu1  ;;  %6030 = vrsqrt.f32 %v7366_v1  ;;  %v4106_v5 = vadd.f32 1.0, %v7366_v1  ;;  %v4111_v49 = vadd.f32 1.0, %v7368_v32  ;;  %vm4051_vm6 = vcmp.eq.f32.partialorder %v7366_v1, inf }
 0x3bb   : > { %6032 = vrsqrt.f32 %v7368_v32  ;;  %vm4053_vm7 = vcmp.eq.f32.partialorder %v7366_v1, 0.0  ;;  %v4054_v0 = vand.u32 2147483648, %v7366_v1  ;;  %vm4086_vm8 = vcmp.eq.f32.partialorder %v7368_v32, inf }
 0x3bc   : > { %6034 = vrcp.f32 %v4106_v5  ;;  %vm4088_vm9 = vcmp.eq.f32.partialorder %v7368_v32, 0.0  ;;  %v4089_v52 = vand.u32 2147483648, %v7368_v32 }
 0x3bd   : > { %v7374_v11 = vpop.f32.mrb[4].mxu0  ;;  %v7376_v7 = vpop.f32.mrb[4].mxu1  ;;  %6036 = vrcp.f32 %v4111_v49 }
 0x3be   : > { %v5392_v8 = vpop.f32.mrb[5].mxu0  ;;  %v5407_v34 = vpop.f32.mrb[5].mxu1  ;;  %6038 = vrsqrt.f32 %v7374_v11  ;;  %v4107_v44 = vadd.f32 1.0, %v7374_v11  ;;  %v4112_v25 = vadd.f32 1.0, %v7376_v7  ;;  %vm4058_vm10 = vcmp.eq.f32.partialorder %v7374_v11, inf }
 0x3bf   : > { %6040 = vrsqrt.f32 %v7376_v7  ;;  %vm4060_vm11 = vcmp.eq.f32.partialorder %v7374_v11, 0.0  ;;  %v4061_v29 = vand.u32 2147483648, %v7374_v11  ;;  %vm4093_vm12 = vcmp.eq.f32.partialorder %v7376_v7, inf }
 0x3c0   : > { %v6023_v35 = vpop.eup %6022  ;;  %6042 = vrcp.f32 %v4107_v44  ;;  %vm4095_vm13 = vcmp.eq.f32.partialorder %v7376_v7, 0.0 }
 0x3c1   : > { %v6025_v10 = vpop.eup %6024  ;;  %v4043_v6 = vmul.f32 %v6023_v35, %v3998_v20  ;;  %v7382_v57 = vpop.f32.mrb[6].mxu0  ;;  %6044 = vrcp.f32 %v4112_v25 }
 0x3c2   : > { %v7384_v46 = vpop.f32.mrb[6].mxu1  ;;  %v4078_v47 = vmul.f32 %v6025_v10, %v4023_v27  ;;  %v5395_v23 = vpop.f32.mrb[7].mxu0  ;;  %6046 = vrsqrt.f32 %v7382_v57  ;;  %v4108_v60 = vadd.f32 1.0, %v7382_v57  ;;  %vm4065_vm14 = vcmp.eq.f32.partialorder %v7382_v57, inf }
 0x3c3   : > { %v5410_v22 = vpop.f32.mrb[7].mxu1  ;;  %v6027_v14 = vpop.eup %6026  ;;  %v4045_v63 = vsel %vm4044_vm2, %v3998_v20, %v4043_v6  ;;  %6048 = vrsqrt.f32 %v7384_v46  ;;  %v4113_v40 = vadd.f32 1.0, %v7384_v46  ;;  %vm4067_vm15 = vcmp.eq.f32.partialorder %v7382_v57, 0.0 }
 0x3c4   : > { %v6029_v50 = vpop.eup %6028  ;;  %v4048_v24 = vsel %vm4046_vm3, %v4047_v43, %v4045_v63  ;;  %v4080_v28 = vsel %vm4079_vm4, %v4023_v27, %v4078_v47  ;;  %6050 = vrcp.f32 %v4108_v60  ;;  %vm4100_vm0 = vcmp.eq.f32.partialorder %v7384_v46, inf }
 0x3c5   : > { %v6031_v26 = vpop.eup %6030  ;;  %v4123_v51 = vmul.f32 %v6027_v14, %v4048_v24  ;;  %v4083_v59 = vsel %vm4081_vm5, %v4082_v48, %v4080_v28  ;;  %v7397_v17 = vpop.f32.mrb[8].mxu0  ;;  %v4103_v47 = vand.u32 2147483648, %v7384_v46  ;;  %vm4102_vm1 = vcmp.eq.f32.partialorder %v7384_v46, 0.0 }
 0x3c6   : > { %v6033_v37 = vpop.eup %6032  ;;  %v4128_v38 = vmul.f32 %v6029_v50, %v4083_v59  ;;  %v4050_v9 = vmul.f32 %v6031_v26, %v7366_v1  ;;  %v5398_v36 = vpop.f32.mrb[9].mxu0  ;;  %6052 = vrsqrt.f32 %v7397_v17  ;;  %vm4072_vm2 = vcmp.eq.f32.partialorder %v7397_v17, inf }
 0x3c7   : > { %v6035_v62 = vpop.eup %6034  ;;  %v4132_v42 = vmul.f32 %v4123_v51, %v7309_v61  ;;  %v4085_v45 = vmul.f32 %v6033_v37, %v7368_v32  ;;  %6054 = vrcp.f32 %v4113_v40  ;;  %vm4074_vm3 = vcmp.eq.f32.partialorder %v7397_v17, 0.0 }
 0x3c8   : > { %v6037_v13 = vpop.eup %6036  ;;  %v4137_v15 = vmul.f32 %v4128_v38, %v7311_v2  ;;  %v4052_v18 = vsel %vm4051_vm6, %v7366_v1, %v4050_v9  ;;  %v4109_v2 = vadd.f32 1.0, %v7397_v17 }
 0x3c9   : > { %v6039_v53 = vpop.eup %6038  ;;  %4141 = vst [vmem:[%s6752_s7] sm:$0xff] %v4132_v42  ;;  %v4055_v61 = vsel %vm4053_vm7, %v4054_v0, %v4052_v18  ;;  %v4087_v30 = vsel %vm4086_vm8, %v7368_v32, %v4085_v45  ;;  %v4096_v32 = vand.u32 2147483648, %v7376_v7 }
 0x3ca   : > { %v6041_v21 = vpop.eup %6040  ;;  %4146 = vst [vmem:[%s6752_s7 + $0x28] sm:$0xff] %v4137_v15  ;;  %v4124_v19 = vmul.f32 %v6035_v62, %v4055_v61  ;;  %v4090_v20 = vsel %vm4088_vm9, %v4089_v52, %v4087_v30  ;;  %v4057_v27 = vmul.f32 %v6039_v53, %v7374_v11  ;;  %6056 = vrcp.f32 %v4109_v2 }
 0x3cb   : > { %v6043_v56 = vpop.eup %6042  ;;  %v4129_v39 = vmul.f32 %v6037_v13, %v4090_v20  ;;  %v4092_v31 = vmul.f32 %v6041_v21, %v7376_v7 }
 0x3cc   : > { %v6045_v1 = vpop.eup %6044  ;;  %v4133_v33 = vmul.f32 %v4124_v19, %v7319_v3  ;;  %v4059_v58 = vsel %vm4058_vm10, %v7374_v11, %v4057_v27 }
 0x3cd   : > { %v6047_v5 = vpop.eup %6046  ;;  %v4138_v49 = vmul.f32 %v4129_v39, %v7321_v4  ;;  %v4062_v8 = vsel %vm4060_vm11, %v4061_v29, %v4059_v58  ;;  %v4094_v34 = vsel %vm4093_vm12, %v7376_v7, %v4092_v31  ;;  %v4068_v4 = vand.u32 2147483648, %v7382_v57 }
 0x3ce   : > { %v6049_v44 = vpop.eup %6048  ;;  %4142 = vst [vmem:[%s6752_s7 + $0x8] sm:$0xff] %v4133_v33  ;;  %v4125_v35 = vmul.f32 %v6043_v56, %v4062_v8  ;;  %v4097_v25 = vsel %vm4095_vm13, %v4096_v32, %v4094_v34  ;;  %v4064_v3 = vmul.f32 %v6047_v5, %v7382_v57 }
 0x3cf   : > { %4147 = vst [vmem:[%s6752_s7 + $0x30] sm:$0xff] %v4138_v49  ;;  %v4130_v11 = vmul.f32 %v6045_v1, %v4097_v25  ;;  %v4099_v10 = vmul.f32 %v6049_v44, %v7384_v46  ;;  %v6051_v6 = vpop.eup %6050 }
 0x3d0   : > { %v4134_v7 = vmul.f32 %v4125_v35, %v7325_v41  ;;  %v4066_v43 = vsel %vm4065_vm14, %v7382_v57, %v4064_v3  ;;  %v6053_v48 = vpop.eup %6052 }
 0x3d1   : > { %v4139_v23 = vmul.f32 %v4130_v11, %v7331_v12  ;;  %v4069_v22 = vsel %vm4067_vm15, %v4068_v4, %v4066_v43  ;;  %v4101_v14 = vsel %vm4100_vm0, %v7384_v46, %v4099_v10  ;;  %v6055_v63 = vpop.eup %6054  ;;  %v4071_v57 = vmul.f32 %v6053_v48, %v7397_v17 }
 0x3d2   : > { %4143 = vst [vmem:[%s6752_s7 + $0x10] sm:$0xff] %v4134_v7  ;;  %v4126_v60 = vmul.f32 %v6051_v6, %v4069_v22  ;;  %v4104_v41 = vsel %vm4102_vm1, %v4103_v47, %v4101_v14  ;;  %v4075_v12 = vand.u32 2147483648, %v7397_v17 }
 0x3d3   : > { %4148 = vst [vmem:[%s6752_s7 + $0x38] sm:$0xff] %v4139_v23  ;;  %v4131_v50 = vmul.f32 %v6055_v63, %v4104_v41  ;;  %v4073_v28 = vsel %vm4072_vm2, %v7397_v17, %v4071_v57 }
 0x3d4   : > { %v4135_v24 = vmul.f32 %v4126_v60, %v7339_v16  ;;  %v6057_v46 = vpop.eup %6056  ;;  %v4076_v51 = vsel %vm4074_vm3, %v4075_v12, %v4073_v28 }
 0x3d5   : > { %v4140_v26 = vmul.f32 %v4131_v50, %v7345_v54  ;;  %v4127_v59 = vmul.f32 %v6057_v46, %v4076_v51 }
 0x3d6   : > { %4144 = vst [vmem:[%s6752_s7 + $0x18] sm:$0xff] %v4135_v24 }
 0x3d7   : > { %4149 = vst [vmem:[%s6752_s7 + $0x40] sm:$0xff] %v4140_v26  ;;  %v4136_v0 = vmul.f32 %v4127_v59, %v7356_v55 }
 0x3d9   : > { %4145 = vst [vmem:[%s6752_s7 + $0x20] sm:$0xff] %v4136_v0 }
 0x3da PF: > { %s7606_s5 = sld [smem:[#allocation18_spill]]  ;;  %s7607_s21 = sld [smem:[#allocation25_spill]] }
 0x3db   : > { %s4166_s9 = sshll.u32 %s6752_s7, 4  ;;  %s4151_s4 = scalar_lea.sflag [#allocation4], %s6740_s1  ;;  %s7466_s9 = int_to_ptr.vmem [resolvable:$true] %s4166_s9 }
 0x3dc   : > { %s6176_s8 = scalar_lea.vmem %s7466_s9, 1152  ;;  %p7609_p6 = scmp.ne.s32.totalorder %s7594_s6, 0 }
 0x3dd   : > { %p6177_p4 = scmp.ne.s32.totalorder %s7466_s9, %s6176_s8  ;;  %s6353_s13 = smov [#allocation10]  }
 0x3de   : > { %s6180_s25 = sshll.u32 %s6353_s13, 4  ;;  %s6181_s25 = int_to_ptr.vmem [resolvable:$false] %s6180_s25 }
 0x3df   : > { %p6178_p11 = pnand %p6177_p4, %p7609_p6  ;;  %s6182_s30 = scalar_lea.vmem %s6181_s25, 2304 }
 0x3e0   : > { %s4675_s23 = sshll.u32 %s7606_s5, 7  ;;  %s7608_s3 = smov %s7607_s21 }
 0x3e1   : > { %s7463_s12 = scalar_lea.hbm %s7607_s21, %s4675_s23  ;;  %p6179_p10 = pneg %p6178_p11 }
 0x3e2   : > { %p6183_p3 = scmp.lt.s32.totalorder %s7466_s9, %s6181_s25  ;;  %p6184_p7 = scmp.lt.s32.totalorder %s6182_s30, %s6176_s8 }
 0x3e4   : > { %p6185_p0 = por %p6184_p7, %p6183_p3 }
 0x3e6   : > { %p6186_p1 = pnand %p6185_p0, %p6179_p10 }
 0x3e8   : > { %6189 = shalt.err (!%p6186_p1)
}
 0x3e9   : > { %s6190_s7 = scalar_lea.hbm %s7463_s12, 1152  ;;  %s6194_s5 = scalar_lea.hbm %s7608_s3, 2304 }
 0x3ea   : > { %p6191_p2 = scmp.ne.s32.totalorder %s7463_s12, %s6190_s7  ;;  %p6195_p9 = scmp.lt.u32.totalorder %s7463_s12, %s7608_s3 }
 0x3eb   : > { %p6196_p8 = scmp.lt.u32.totalorder %s6194_s5, %s6190_s7  ;;  %p6198_p4 = scmp.lt.u32.totalorder %s6190_s7, %s7463_s12 }
 0x3ec   : > { %p6192_p12 = pnand %p6191_p2, %p7609_p6 }
 0x3ed   : > { %p6197_p13 = por %p6196_p8, %p6195_p9 }
 0x3ee   : > { %p6193_p5 = pneg %p6192_p12 }
 0x3ef   : > { %p6199_p11 = por %p6198_p4, %p6197_p13 }
 0x3f1   : > { %p6200_p10 = pnand %p6199_p11, %p6193_p5 }
 0x3f3   : > { %6203 = shalt.err (!%p6200_p10)
}
 0x3f4   : > { %s6354_s24 = smov 128   ;;  %s6355_s21 = smov 256  }
 0x3f5   : > { %s6356_s8 = smov 8  }
 0x3f6   : > { %5466 = dma.vmem_to_hbm [thread:$0]  (%p7609_p6), %s7466_s9, 1152, %s7463_s12, %s4151_s4, %s6354_s24, %s6355_s21, %s6356_s8  }
 0x3f7 PF: > { %p5489_p3 = scmp.ge.s32.totalorder %s6334_s28, 2  ;;  %s4181_s13 = sand.u32 1, %s6282_s15  }
 0x3f8   : > { %p7610_p7 = scmp.ne.s32.totalorder %s7595_s18, 0  ;;  %s4182_s25 = scalar_lea.sflag [#allocation4], %s4181_s13 }
 0x3fa   : > { %p5483_p0 = pnand %p5489_p3, %p7610_p7 }
 0x3fc   : > { %6277 = dma.done.wait (!%p5483_p0), %s4182_s25, 1152  }
 0x3fd   : > { %6279 = vsyncadd (!%p5483_p0), %s4182_s25, 4294966144  ;;  %s24_s28 = sadd.s32 1, %s6334_s28   ;;  %s7612_s6 = sld [smem:[#allocation16_spill]] }
 0x3fe   : > { %p7497_p1 = scmp.ge.s32.totalorder %s24_s28, 14   ;;  %s7613_s23 = sld [smem:[#allocation21_spill]] }
 0x3ff   : > { %s7614_s24 = sld [smem:[#allocation19_spill]]  ;;  %s7615_s1 = sld [smem:[#allocation20_spill]] }
 0x400   : > { %s7616_s15 = smov %s6286_s16  ;;  %s7617_s16 = smov %s6290_s17 }
 0x401   : > { %s7618_s17 = smov %s6673_s26  ;;  %s7619_s18 = smov %s6298_s19 }
 0x402   : > { %s7620_s19 = smov %s6302_s20  ;;  %s7621_s20 = smov %s6678_s11 }
 0x403   : > { %s7622_s21 = smov %s6310_s22  ;;  %s7623_s22 = smov %s7612_s6 }
 0x404   : > { %s7624_s25 = smov %s6330_s27  ;;  %s7626_s27 = smov %s7632_s14 }
 0x405   : > { %s7625_s26 = smov %s7615_s1  ;;  %23 = sbr.rel (!%p7497_p1) target bundleno = 18 (0x12), region = 117 }
 0x40c   :  { %4187 = vsyncpa [#allocation3], 1 }
 0x40d   :  { %4189 = vsyncpa [#allocation3 + $0x1], 1 }
 0x40e   :  { %4190 = vsyncpa [#allocation6], 1 }
 0x40f   :  { %4192 = vsyncpa [#allocation6 + $0x1], 1 }
 0x410   :  { %4193 = vsyncpa [#allocation9], 1 }
 0x411   :  { %4194 = vsyncpa [#allocation4], 1 }
 0x412   :  { %4196 = vsyncpa [#allocation4 + $0x1], 1 }

</bundles_post_ra>
